<compile_context>
chip_gen: v5e
topology: v5e:2x2
jax: 0.10.0
libtpu: 0.0.40
codegen_flags: <defaults>
</compile_context>

<pallas_src>
import jax
import jax.numpy as jnp
import numpy as np
from jax.experimental import pallas as pl
from jax.experimental.pallas import tpu as pltpu


# ----------------------------------------------------------------------------
# Pallas kernel: the full T-step decoder forward for one batch block
# ----------------------------------------------------------------------------
def decoder_kernel(
    x_enc_ref,   # (Bb, T, m)        encoder outputs (batch block)
    y_prev_ref,  # (Bb, T)           raw y history (batch block)
    wmat_ref,    # (2p + m, ncol)    packed matrices: w_step_d | w1c_t | w1x_t
    rows_ref,    # (8, ncol)         packed row vectors + scalars
    y_out_ref,   # (Bb, 1)           y_pred
):
    Bb, T, m = x_enc_ref.shape
    p = (wmat_ref.shape[0] - m) // 2
    ncol = wmat_ref.shape[1]
    off = ncol - 4 * p                       # lane offset of the W_hh^T block

    x_enc = x_enc_ref[...]                   # (Bb, T, m)
    y_prev = y_prev_ref[...]                 # (Bb, T)

    # --- static slab views (sublane-aligned slices, no data movement) --------
    w_step_d = wmat_ref[0:p, :]              # (p, ncol): [W1_d^T | 0 | W_hh^T]
    w1c_t = wmat_ref[p:2 * p, 0:m]           # (p, m)   attn W1, c part (transposed)
    w1x_t = wmat_ref[2 * p:2 * p + m, 0:m]   # (m, m)   attn W1, X part (transposed)

    b1 = rows_ref[0:1, 0:m]                  # (1, m)
    w2 = rows_ref[1:2, 0:m]                  # (1, m)   attn 2nd linear (N=1)
    wih_row = rows_ref[2:3, 0:4 * p]         # (1, 4p)  W_ih^T  (input_size=1)
    b_lstm = rows_ref[3:4, 0:4 * p]          # (1, 4p)  b_ih + b_hh
    wfc_ctx = rows_ref[4:5, 0:m]             # (1, m)   fc weight, context part
    wfin_d = rows_ref[5:6, 0:p]              # (1, p)   fc_final weight, d part
    wfin_ctx = rows_ref[6:7, 0:m]            # (1, m)   fc_final weight, ctx part
    fc_wy = rows_ref[7:8, 0:1]               # (1, 1)   fc weight, y column
    fc_b = rows_ref[7:8, 1:2]                # (1, 1)   fc bias
    b_fin = rows_ref[7:8, 2:3]               # (1, 1)   fc_final bias

    # --- loop-invariant attention projection of X_encoded (one MXU pass) -----
    z = jnp.dot(
        x_enc.reshape(Bb * T, m), w1x_t, preferred_element_type=jnp.float32
    ).reshape(Bb, T, m) + b1                 # (Bb, T, m)

    # --- fold scalar fc(y) contribution once (VPU, hoisted out of the loop) --
    y_contrib = y_prev * fc_wy + fc_b        # (Bb, T)

    d = jnp.zeros((Bb, p), jnp.float32)      # decoder hidden state
    c = jnp.zeros((Bb, p), jnp.float32)      # decoder cell state
    context = jnp.zeros((Bb, m), jnp.float32)

    # TODO(synk): for T >> 8 switch to lax.fori_loop(unroll=2..4); at T=8 the
    # full static unroll gives the LLO scheduler maximum visibility.
    for t in range(T):
        # Two independent MXU pushes -- no lane-concat on the critical path.
        big_d = jnp.dot(d, w_step_d, preferred_element_type=jnp.float32)   # (Bb, ncol)
        proj_c = jnp.dot(c, w1c_t, preferred_element_type=jnp.float32)     # (Bb, m)
        proj = big_d[:, :m] + proj_c                                        # (Bb, m)
        gates_h = big_d[:, off:]                                            # (Bb, 4p)

        # ---- temporal attention over the T encoded steps ---------------------
        hid = jnp.tanh(z + proj[:, None, :])                                # (Bb, T, m)
        e = jnp.sum(hid * w2[None, :, :], axis=2)                           # (Bb, T)
        e = e - jnp.max(e, axis=1, keepdims=True)                           # (b2 dropped)
        pexp = jnp.exp(e)
        inv = pl.reciprocal(jnp.sum(pexp, axis=1, keepdims=True), approx=True)
        beta = pexp * inv                                                   # (Bb, T)
        context = jnp.sum(beta[:, :, None] * x_enc, axis=1)                 # (Bb, m)

        # ---- y_tilde = fc([context, y_prev[:, t]])  (N=1 -> VPU + reduce) ----
        y_tilde = (jnp.sum(context * wfc_ctx, axis=1, keepdims=True)
                   + y_contrib[:, t:t + 1])                                 # (Bb, 1)

        # ---- one LSTM cell step (gate order i, f, g, o) -----------------------
        gates = gates_h + y_tilde * wih_row + b_lstm                        # (Bb, 4p)
        sig = jax.nn.sigmoid(gates)            # one full-width EUP pass
        i_g = sig[:, 0 * p:1 * p]
        f_g = sig[:, 1 * p:2 * p]
        o_g = sig[:, 3 * p:4 * p]
        g_g = jnp.tanh(gates[:, 2 * p:3 * p])  # tanh only on the g slice
        c = f_g * c + i_g * g_g
        d = o_g * jnp.tanh(c)

    # ---- y_pred = fc_final([d, context]) -------------------------------------
    y_pred = (jnp.sum(d * wfin_d, axis=1, keepdims=True)
              + jnp.sum(context * wfin_ctx, axis=1, keepdims=True)
              + b_fin)
    y_out_ref[...] = y_pred


# ----------------------------------------------------------------------------
# One-time parameter packing (hoisted out of the per-call forward path)
# ----------------------------------------------------------------------------
def prepare_params(params, *, enc_hidden, dec_hidden):
    """Pack all decoder weights into two f32 slabs (runs once, not per call)."""
    m, p = enc_hidden, dec_hidden
    off = ((m + 127) // 128) * 128          # lane-aligned offset of W_hh^T block
    ncol = off + 4 * p
    f32 = jnp.float32

    w1 = jnp.asarray(params["attn_w1"], f32)        # (m, 2p + m)
    b1 = jnp.asarray(params["attn_b1"], f32)        # (m,)
    w2 = jnp.asarray(params["attn_w2"], f32)        # (1, m)
    fc_w = jnp.asarray(params["fc_w"], f32)         # (1, m + 1)
    fc_b = jnp.asarray(params["fc_b"], f32)         # (1,)
    W_ih = jnp.asarray(params["W_ih"], f32)         # (4p, 1)
    W_hh = jnp.asarray(params["W_hh"], f32)         # (4p, p)
    b_lstm = jnp.asarray(params["b_ih"], f32) + jnp.asarray(params["b_hh"], f32)
    fcfin_w = jnp.asarray(params["fcfin_w"], f32)   # (1, p + m)
    fcfin_b = jnp.asarray(params["fcfin_b"], f32)   # (1,)

    # Matrix slab:
    #   rows [0, p)        : w_step_d = [W1_d^T (cols 0:m) | 0 | W_hh^T (cols off:)]
    #   rows [p, 2p)       : W1_c^T   (cols 0:m)
    #   rows [2p, 2p + m)  : W1_x^T   (cols 0:m)
    w_mats = jnp.zeros((2 * p + m, ncol), f32)
    w_mats = w_mats.at[0:p, 0:m].set(jnp.transpose(w1[:, 0:p]))
    w_mats = w_mats.at[0:p, off:off + 4 * p].set(jnp.transpose(W_hh))
    w_mats = w_mats.at[p:2 * p, 0:m].set(jnp.transpose(w1[:, p:2 * p]))
    w_mats = w_mats.at[2 * p:2 * p + m, 0:m].set(jnp.transpose(w1[:, 2 * p:]))

    # Row slab: one logical vector per row, scalars in row 7.
    v_rows = jnp.zeros((8, ncol), f32)
    v_rows = v_rows.at[0, 0:m].set(b1)
    v_rows = v_rows.at[1, 0:m].set(w2.reshape(m))
    v_rows = v_rows.at[2, 0:4 * p].set(W_ih.reshape(4 * p))
    v_rows = v_rows.at[3, 0:4 * p].set(b_lstm.reshape(4 * p))
    v_rows = v_rows.at[4, 0:m].set(fc_w[0, :m])
    v_rows = v_rows.at[5, 0:p].set(fcfin_w[0, :p])
    v_rows = v_rows.at[6, 0:m].set(fcfin_w[0, p:])
    v_rows = v_rows.at[7, 0].set(fc_w[0, m])        # fc weight for y_prev column
    v_rows = v_rows.at[7, 1].set(fc_b[0])           # fc bias
    v_rows = v_rows.at[7, 2].set(fcfin_b[0])        # fc_final bias
    # Note: attn_b2 is intentionally not packed -- a constant logit offset is
    # softmax-invariant.
    return w_mats, v_rows


# ----------------------------------------------------------------------------
# Forward wrapper: only the pallas_call (no per-call re-layout)
# ----------------------------------------------------------------------------
@jax.jit
def decoder_forward(X_encoded, y_prev, w_mats, v_rows):
    B, T, m = X_encoded.shape
    f32 = jnp.float32
    x_enc = X_encoded.astype(f32)
    y_prev = y_prev.astype(f32)

    # Batch grid axis: lets independent per-batch recurrences split across the
    # two TensorCores on v7x when B is large; collapses to grid=(1,) here.
    bb = 8 if (B > 8 and B % 8 == 0) else B
    grid = (B // bb,)

    return pl.pallas_call(
        decoder_kernel,
        out_shape=jax.ShapeDtypeStruct((B, 1), f32),
        grid=grid,
        in_specs=[
            pl.BlockSpec((bb, T, m), lambda i: (i, 0, 0)),
            pl.BlockSpec((bb, T), lambda i: (i, 0)),
            pl.BlockSpec(w_mats.shape, lambda i: (0, 0)),
            pl.BlockSpec(v_rows.shape, lambda i: (0, 0)),
        ],
        out_specs=pl.BlockSpec((bb, 1), lambda i: (i, 0)),
        compiler_params=pltpu.CompilerParams(
            dimension_semantics=("parallel",),
            vmem_limit_bytes=32 * 1024 * 1024,   # explicit budget (v7x-safe)
        ),
    )(x_enc, y_prev, w_mats, v_rows)


# ----------------------------------------------------------------------------
# Pure-JAX reference (mirrors the PyTorch Decoder.forward exactly)
# ----------------------------------------------------------------------------
def decoder_reference(X_encoded, y_prev, params, *, T, m, p):
    B = X_encoded.shape[0]
    d = jnp.zeros((B, p), jnp.float32)
    c = jnp.zeros((B, p), jnp.float32)
    context = jnp.zeros((B, m), jnp.float32)
    for t in range(T):
        dd = jnp.broadcast_to(d[:, None, :], (B, T, p))
        cc = jnp.broadcast_to(c[:, None, :], (B, T, p))
        x = jnp.concatenate([dd, cc, X_encoded], axis=2).reshape(-1, 2 * p + m)
        h1 = jnp.tanh(x @ params["attn_w1"].T + params["attn_b1"])
        e = (h1 @ params["attn_w2"].T + params["attn_b2"]).reshape(B, T)
        beta = jax.nn.softmax(e, axis=1)
        context = jnp.einsum("bt,btm->bm", beta, X_encoded)
        y_tilde = (jnp.concatenate([context, y_prev[:, t:t + 1]], axis=1)
                   @ params["fc_w"].T + params["fc_b"])
        gates = (y_tilde @ params["W_ih"].T + params["b_ih"]
                 + d @ params["W_hh"].T + params["b_hh"])
        i_g, f_g, g_g, o_g = jnp.split(gates, 4, axis=1)
        i_g = jax.nn.sigmoid(i_g)
        f_g = jax.nn.sigmoid(f_g)
        g_g = jnp.tanh(g_g)
        o_g = jax.nn.sigmoid(o_g)
        c = f_g * c + i_g * g_g
        d = o_g * jnp.tanh(c)
    y_pred = (jnp.concatenate([d, context], axis=1)
              @ params["fcfin_w"].T + params["fcfin_b"])
    return y_pred


# ----------------------------------------------------------------------------
# Driver
# ----------------------------------------------------------------------------
if __name__ == "__main__":
    T = 8              # number of encoded timesteps
    ENC_HIDDEN = 32    # encoder_num_hidden (m)
    DEC_HIDDEN = 32    # decoder_num_hidden (p)
    B = 2              # batch (larger B is nearly free inside one invocation)

    key = jax.random.PRNGKey(0)
    ks = jax.random.split(key, 14)
    scale = 0.1
    m, p = ENC_HIDDEN, DEC_HIDDEN

    X_encoded = jax.random.normal(ks[0], (B, T, m), jnp.float32)
    y_prev = jax.random.normal(ks[1], (B, T), jnp.float32)

    params = {
        # attn_layer = Linear(2p+m, m) -> Tanh -> Linear(m, 1)
        "attn_w1": jax.random.normal(ks[2], (m, 2 * p + m), jnp.float32) * scale,
        "attn_b1": jax.random.normal(ks[3], (m,), jnp.float32) * scale,
        "attn_w2": jax.random.normal(ks[4], (1, m), jnp.float32) * scale,
        "attn_b2": jax.random.normal(ks[5], (1,), jnp.float32) * scale,
        # lstm_layer = LSTM(input_size=1, hidden_size=p)
        "W_ih": jax.random.normal(ks[6], (4 * p, 1), jnp.float32) * scale,
        "W_hh": jax.random.normal(ks[7], (4 * p, p), jnp.float32) * scale,
        "b_ih": jax.random.normal(ks[8], (4 * p,), jnp.float32) * scale,
        "b_hh": jax.random.normal(ks[9], (4 * p,), jnp.float32) * scale,
        # fc = Linear(m + 1, 1)   (weight init: normal_(), std 1, like the module)
        "fc_w": jax.random.normal(ks[10], (1, m + 1), jnp.float32),
        "fc_b": jax.random.normal(ks[11], (1,), jnp.float32) * scale,
        # fc_final = Linear(p + m, 1)
        "fcfin_w": jax.random.normal(ks[12], (1, p + m), jnp.float32) * scale,
        "fcfin_b": jax.random.normal(ks[13], (1,), jnp.float32) * scale,
    }

    # One-time packing (outside the per-call forward path).
    w_mats, v_rows = prepare_params(params, enc_hidden=ENC_HIDDEN,
                                    dec_hidden=DEC_HIDDEN)

    y_pred = decoder_forward(X_encoded, y_prev, w_mats, v_rows)
    jax.block_until_ready(y_pred)

    y_ref = decoder_reference(X_encoded, y_prev, params, T=T, m=m, p=p)
    # Tolerance slightly relaxed vs. pure f32 because the kernel uses the
    # approximate EUP reciprocal for the softmax normalisation.
    np.testing.assert_allclose(np.asarray(y_pred), np.asarray(y_ref),
                               rtol=5e-3, atol=1e-3)

    assert y_pred.shape == (B, 1)
    print("KERNEL_OK")
</pallas_src>

<mosaic_0001>
module attributes {stable_mosaic.version = 11 : i64} {
  func.func @decoder_kernel(%arg0: i32, %arg1: memref<2x8x32xf32, #tpu.memory_space<vmem>>, %arg2: memref<2x8xf32, #tpu.memory_space<vmem>>, %arg3: memref<96x256xf32, #tpu.memory_space<vmem>>, %arg4: memref<8x256xf32, #tpu.memory_space<vmem>>, %arg5: memref<2x1xf32, #tpu.memory_space<vmem>>) attributes {dimension_semantics = [#tpu.dimension_semantics<parallel>], iteration_bounds = array<i64: 1>, scalar_prefetch = 0 : i64, scratch_operands = 0 : i64, tpu.core_type = #tpu.core_type<tc>, window_params = [{transform_indices = @transform_0, window_bounds = array<i64: 2, 8, 32>}, {transform_indices = @transform_1, window_bounds = array<i64: 2, 8>}, {pipeline_mode = #tpu.pipeline_mode<synchronous>, transform_indices = @transform_2, window_bounds = array<i64: 96, 256>}, {pipeline_mode = #tpu.pipeline_mode<synchronous>, transform_indices = @transform_3, window_bounds = array<i64: 8, 256>}, {transform_indices = @transform_4, window_bounds = array<i64: 2, 1>}]} {
    %c0 = arith.constant 0 : index
    %c0_0 = arith.constant 0 : index
    %c0_1 = arith.constant 0 : index
    %0 = vector.load %arg1[%c0, %c0_0, %c0_1] : memref<2x8x32xf32, #tpu.memory_space<vmem>>, vector<2x8x32xf32>
    %c0_2 = arith.constant 0 : index
    %c0_3 = arith.constant 0 : index
    %1 = vector.load %arg2[%c0_2, %c0_3] : memref<2x8xf32, #tpu.memory_space<vmem>>, vector<2x8xf32>
    %c0_4 = arith.constant 0 : index
    %c0_5 = arith.constant 0 : index
    %2 = vector.load %arg3[%c0_4, %c0_5] : memref<96x256xf32, #tpu.memory_space<vmem>>, vector<32x256xf32>
    %c32 = arith.constant 32 : index
    %c0_6 = arith.constant 0 : index
    %3 = vector.load %arg3[%c32, %c0_6] : memref<96x256xf32, #tpu.memory_space<vmem>>, vector<32x32xf32>
    %c64 = arith.constant 64 : index
    %c0_7 = arith.constant 0 : index
    %4 = vector.load %arg3[%c64, %c0_7] : memref<96x256xf32, #tpu.memory_space<vmem>>, vector<32x32xf32>
    %c0_8 = arith.constant 0 : index
    %c0_9 = arith.constant 0 : index
    %5 = vector.load %arg4[%c0_8, %c0_9] : memref<8x256xf32, #tpu.memory_space<vmem>>, vector<1x32xf32>
    %c1 = arith.constant 1 : index
    %c0_10 = arith.constant 0 : index
    %6 = vector.load %arg4[%c1, %c0_10] : memref<8x256xf32, #tpu.memory_space<vmem>>, vector<1x32xf32>
    %c2 = arith.constant 2 : index
    %c0_11 = arith.constant 0 : index
    %7 = vector.load %arg4[%c2, %c0_11] : memref<8x256xf32, #tpu.memory_space<vmem>>, vector<1x128xf32>
    %c3 = arith.constant 3 : index
    %c0_12 = arith.constant 0 : index
    %8 = vector.load %arg4[%c3, %c0_12] : memref<8x256xf32, #tpu.memory_space<vmem>>, vector<1x128xf32>
    %c4 = arith.constant 4 : index
    %c0_13 = arith.constant 0 : index
    %9 = vector.load %arg4[%c4, %c0_13] : memref<8x256xf32, #tpu.memory_space<vmem>>, vector<1x32xf32>
    %c5 = arith.constant 5 : index
    %c0_14 = arith.constant 0 : index
    %10 = vector.load %arg4[%c5, %c0_14] : memref<8x256xf32, #tpu.memory_space<vmem>>, vector<1x32xf32>
    %c6 = arith.constant 6 : index
    %c0_15 = arith.constant 0 : index
    %11 = vector.load %arg4[%c6, %c0_15] : memref<8x256xf32, #tpu.memory_space<vmem>>, vector<1x32xf32>
    %c7 = arith.constant 7 : index
    %c0_16 = arith.constant 0 : index
    %12 = vector.load %arg4[%c7, %c0_16] : memref<8x256xf32, #tpu.memory_space<vmem>>, vector<1x1xf32>
    %c7_17 = arith.constant 7 : index
    %c1_18 = arith.constant 1 : index
    %13 = vector.load %arg4[%c7_17, %c1_18] : memref<8x256xf32, #tpu.memory_space<vmem>>, vector<1x1xf32>
    %c7_19 = arith.constant 7 : index
    %c2_20 = arith.constant 2 : index
    %14 = vector.load %arg4[%c7_19, %c2_20] : memref<8x256xf32, #tpu.memory_space<vmem>>, vector<1x1xf32>
    %15 = vector.shape_cast %0 : vector<2x8x32xf32> to vector<16x32xf32>
    %cst = arith.constant dense<0.000000e+00> : vector<16x32xf32>
    %16 = tpu.matmul %15, %4, %cst {dimension_numbers = #tpu.dot_dimension_numbers<[1], [0], [0], [1], [0, 0, 1, 1], [], []>} : vector<16x32xf32>, vector<32x32xf32>, vector<16x32xf32> -> vector<16x32xf32>
    %17 = vector.shape_cast %16 : vector<16x32xf32> to vector<2x8x32xf32>
    %18 = vector.shape_cast %5 : vector<1x32xf32> to vector<1x1x32xf32>
    %19 = vector.broadcast %18 : vector<1x1x32xf32> to vector<2x8x32xf32>
    %20 = arith.addf %17, %19 : vector<2x8x32xf32>
    %21 = vector.broadcast %12 : vector<1x1xf32> to vector<2x8xf32>
    %22 = arith.mulf %1, %21 : vector<2x8xf32>
    %23 = vector.broadcast %13 : vector<1x1xf32> to vector<2x8xf32>
    %24 = arith.addf %22, %23 : vector<2x8xf32>
    %cst_21 = arith.constant 0.000000e+00 : f32
    %25 = vector.broadcast %cst_21 : f32 to vector<2x32xf32>
    %cst_22 = arith.constant 0.000000e+00 : f32
    %26 = vector.broadcast %cst_22 : f32 to vector<2x32xf32>
    %cst_23 = arith.constant dense<0.000000e+00> : vector<2x256xf32>
    %27 = tpu.matmul %25, %2, %cst_23 {dimension_numbers = #tpu.dot_dimension_numbers<[1], [0], [0], [1], [0, 0, 1, 1], [], []>} : vector<2x32xf32>, vector<32x256xf32>, vector<2x256xf32> -> vector<2x256xf32>
    %cst_24 = arith.constant dense<0.000000e+00> : vector<2x32xf32>
    %28 = tpu.matmul %26, %3, %cst_24 {dimension_numbers = #tpu.dot_dimension_numbers<[1], [0], [0], [1], [0, 0, 1, 1], [], []>} : vector<2x32xf32>, vector<32x32xf32>, vector<2x32xf32> -> vector<2x32xf32>
    %29 = vector.extract_strided_slice %27 {offsets = [0, 0], sizes = [2, 32], strides = [1, 1]} : vector<2x256xf32> to vector<2x32xf32>
    %30 = arith.addf %29, %28 : vector<2x32xf32>
    %31 = vector.extract_strided_slice %27 {offsets = [0, 128], sizes = [2, 128], strides = [1, 1]} : vector<2x256xf32> to vector<2x128xf32>
    %32 = vector.shape_cast %30 : vector<2x32xf32> to vector<2x1x32xf32>
    %33 = vector.broadcast %32 : vector<2x1x32xf32> to vector<2x8x32xf32>
    %34 = arith.addf %20, %33 : vector<2x8x32xf32>
    %35 = math.tanh %34 : vector<2x8x32xf32>
    %36 = vector.shape_cast %6 : vector<1x32xf32> to vector<1x1x32xf32>
    %37 = vector.broadcast %36 : vector<1x1x32xf32> to vector<2x8x32xf32>
    %38 = arith.mulf %35, %37 : vector<2x8x32xf32>
    %cst_25 = arith.constant dense<0.000000e+00> : vector<2x8xf32>
    %39 = vector.multi_reduction <add>, %38, %cst_25 [2] : vector<2x8x32xf32> to vector<2x8xf32>
    %cst_26 = arith.constant dense<0xFF800000> : vector<2xf32>
    %40 = vector.multi_reduction <maximumf>, %39, %cst_26 [1] : vector<2x8xf32> to vector<2xf32>
    %41 = vector.shape_cast %40 : vector<2xf32> to vector<2x1xf32>
    %42 = vector.broadcast %41 : vector<2x1xf32> to vector<2x8xf32>
    %43 = arith.subf %39, %42 : vector<2x8xf32>
    %44 = math.exp %43 : vector<2x8xf32>
    %cst_27 = arith.constant dense<0.000000e+00> : vector<2xf32>
    %45 = vector.multi_reduction <add>, %44, %cst_27 [1] : vector<2x8xf32> to vector<2xf32>
    %46 = vector.shape_cast %45 : vector<2xf32> to vector<2x1xf32>
    %47 = tpu.reciprocal %46 {approx = true} : vector<2x1xf32> -> vector<2x1xf32>
    %48 = vector.broadcast %47 : vector<2x1xf32> to vector<2x8xf32>
    %49 = arith.mulf %44, %48 : vector<2x8xf32>
    %50 = vector.shape_cast %49 : vector<2x8xf32> to vector<2x8x1xf32>
    %51 = vector.broadcast %50 : vector<2x8x1xf32> to vector<2x8x32xf32>
    %52 = arith.mulf %51, %0 : vector<2x8x32xf32>
    %cst_28 = arith.constant dense<0.000000e+00> : vector<2x32xf32>
    %53 = vector.multi_reduction <add>, %52, %cst_28 [1] : vector<2x8x32xf32> to vector<2x32xf32>
    %54 = vector.broadcast %9 : vector<1x32xf32> to vector<2x32xf32>
    %55 = arith.mulf %53, %54 : vector<2x32xf32>
    %cst_29 = arith.constant dense<0.000000e+00> : vector<2xf32>
    %56 = vector.multi_reduction <add>, %55, %cst_29 [1] : vector<2x32xf32> to vector<2xf32>
    %57 = vector.shape_cast %56 : vector<2xf32> to vector<2x1xf32>
    %58 = vector.extract_strided_slice %24 {offsets = [0, 0], sizes = [2, 1], strides = [1, 1]} : vector<2x8xf32> to vector<2x1xf32>
    %59 = arith.addf %57, %58 : vector<2x1xf32>
    %60 = vector.broadcast %59 : vector<2x1xf32> to vector<2x128xf32>
    %61 = vector.broadcast %7 : vector<1x128xf32> to vector<2x128xf32>
    %62 = arith.mulf %60, %61 : vector<2x128xf32>
    %63 = arith.addf %31, %62 : vector<2x128xf32>
    %64 = vector.broadcast %8 : vector<1x128xf32> to vector<2x128xf32>
    %65 = arith.addf %63, %64 : vector<2x128xf32>
    %66 = arith.negf %65 : vector<2x128xf32>
    %67 = math.exp %66 : vector<2x128xf32>
    %cst_30 = arith.constant 1.000000e+00 : f32
    %68 = vector.broadcast %cst_30 : f32 to vector<2x128xf32>
    %69 = arith.addf %68, %67 : vector<2x128xf32>
    %70 = arith.divf %68, %69 : vector<2x128xf32>
    %71 = vector.extract_strided_slice %70 {offsets = [0, 0], sizes = [2, 32], strides = [1, 1]} : vector<2x128xf32> to vector<2x32xf32>
    %72 = vector.extract_strided_slice %70 {offsets = [0, 32], sizes = [2, 32], strides = [1, 1]} : vector<2x128xf32> to vector<2x32xf32>
    %73 = vector.extract_strided_slice %70 {offsets = [0, 96], sizes = [2, 32], strides = [1, 1]} : vector<2x128xf32> to vector<2x32xf32>
    %74 = vector.extract_strided_slice %65 {offsets = [0, 64], sizes = [2, 32], strides = [1, 1]} : vector<2x128xf32> to vector<2x32xf32>
    %75 = math.tanh %74 : vector<2x32xf32>
    %76 = arith.mulf %72, %26 : vector<2x32xf32>
    %77 = arith.mulf %71, %75 : vector<2x32xf32>
    %78 = arith.addf %76, %77 : vector<2x32xf32>
    %79 = math.tanh %78 : vector<2x32xf32>
    %80 = arith.mulf %73, %79 : vector<2x32xf32>
    %cst_31 = arith.constant dense<0.000000e+00> : vector<2x256xf32>
    %81 = tpu.matmul %80, %2, %cst_31 {dimension_numbers = #tpu.dot_dimension_numbers<[1], [0], [0], [1], [0, 0, 1, 1], [], []>} : vector<2x32xf32>, vector<32x256xf32>, vector<2x256xf32> -> vector<2x256xf32>
    %cst_32 = arith.constant dense<0.000000e+00> : vector<2x32xf32>
    %82 = tpu.matmul %78, %3, %cst_32 {dimension_numbers = #tpu.dot_dimension_numbers<[1], [0], [0], [1], [0, 0, 1, 1], [], []>} : vector<2x32xf32>, vector<32x32xf32>, vector<2x32xf32> -> vector<2x32xf32>
    %83 = vector.extract_strided_slice %81 {offsets = [0, 0], sizes = [2, 32], strides = [1, 1]} : vector<2x256xf32> to vector<2x32xf32>
    %84 = arith.addf %83, %82 : vector<2x32xf32>
    %85 = vector.extract_strided_slice %81 {offsets = [0, 128], sizes = [2, 128], strides = [1, 1]} : vector<2x256xf32> to vector<2x128xf32>
    %86 = vector.shape_cast %84 : vector<2x32xf32> to vector<2x1x32xf32>
    %87 = vector.broadcast %86 : vector<2x1x32xf32> to vector<2x8x32xf32>
    %88 = arith.addf %20, %87 : vector<2x8x32xf32>
    %89 = math.tanh %88 : vector<2x8x32xf32>
    %90 = vector.shape_cast %6 : vector<1x32xf32> to vector<1x1x32xf32>
    %91 = vector.broadcast %90 : vector<1x1x32xf32> to vector<2x8x32xf32>
    %92 = arith.mulf %89, %91 : vector<2x8x32xf32>
    %cst_33 = arith.constant dense<0.000000e+00> : vector<2x8xf32>
    %93 = vector.multi_reduction <add>, %92, %cst_33 [2] : vector<2x8x32xf32> to vector<2x8xf32>
    %cst_34 = arith.constant dense<0xFF800000> : vector<2xf32>
    %94 = vector.multi_reduction <maximumf>, %93, %cst_34 [1] : vector<2x8xf32> to vector<2xf32>
    %95 = vector.shape_cast %94 : vector<2xf32> to vector<2x1xf32>
    %96 = vector.broadcast %95 : vector<2x1xf32> to vector<2x8xf32>
    %97 = arith.subf %93, %96 : vector<2x8xf32>
    %98 = math.exp %97 : vector<2x8xf32>
    %cst_35 = arith.constant dense<0.000000e+00> : vector<2xf32>
    %99 = vector.multi_reduction <add>, %98, %cst_35 [1] : vector<2x8xf32> to vector<2xf32>
    %100 = vector.shape_cast %99 : vector<2xf32> to vector<2x1xf32>
    %101 = tpu.reciprocal %100 {approx = true} : vector<2x1xf32> -> vector<2x1xf32>
    %102 = vector.broadcast %101 : vector<2x1xf32> to vector<2x8xf32>
    %103 = arith.mulf %98, %102 : vector<2x8xf32>
    %104 = vector.shape_cast %103 : vector<2x8xf32> to vector<2x8x1xf32>
    %105 = vector.broadcast %104 : vector<2x8x1xf32> to vector<2x8x32xf32>
    %106 = arith.mulf %105, %0 : vector<2x8x32xf32>
    %cst_36 = arith.constant dense<0.000000e+00> : vector<2x32xf32>
    %107 = vector.multi_reduction <add>, %106, %cst_36 [1] : vector<2x8x32xf32> to vector<2x32xf32>
    %108 = vector.broadcast %9 : vector<1x32xf32> to vector<2x32xf32>
    %109 = arith.mulf %107, %108 : vector<2x32xf32>
    %cst_37 = arith.constant dense<0.000000e+00> : vector<2xf32>
    %110 = vector.multi_reduction <add>, %109, %cst_37 [1] : vector<2x32xf32> to vector<2xf32>
    %111 = vector.shape_cast %110 : vector<2xf32> to vector<2x1xf32>
    %112 = vector.extract_strided_slice %24 {offsets = [0, 1], sizes = [2, 1], strides = [1, 1]} : vector<2x8xf32> to vector<2x1xf32>
    %113 = arith.addf %111, %112 : vector<2x1xf32>
    %114 = vector.broadcast %113 : vector<2x1xf32> to vector<2x128xf32>
    %115 = vector.broadcast %7 : vector<1x128xf32> to vector<2x128xf32>
    %116 = arith.mulf %114, %115 : vector<2x128xf32>
    %117 = arith.addf %85, %116 : vector<2x128xf32>
    %118 = vector.broadcast %8 : vector<1x128xf32> to vector<2x128xf32>
    %119 = arith.addf %117, %118 : vector<2x128xf32>
    %120 = arith.negf %119 : vector<2x128xf32>
    %121 = math.exp %120 : vector<2x128xf32>
    %cst_38 = arith.constant 1.000000e+00 : f32
    %122 = vector.broadcast %cst_38 : f32 to vector<2x128xf32>
    %123 = arith.addf %122, %121 : vector<2x128xf32>
    %124 = arith.divf %122, %123 : vector<2x128xf32>
    %125 = vector.extract_strided_slice %124 {offsets = [0, 0], sizes = [2, 32], strides = [1, 1]} : vector<2x128xf32> to vector<2x32xf32>
    %126 = vector.extract_strided_slice %124 {offsets = [0, 32], sizes = [2, 32], strides = [1, 1]} : vector<2x128xf32> to vector<2x32xf32>
    %127 = vector.extract_strided_slice %124 {offsets = [0, 96], sizes = [2, 32], strides = [1, 1]} : vector<2x128xf32> to vector<2x32xf32>
    %128 = vector.extract_strided_slice %119 {offsets = [0, 64], sizes = [2, 32], strides = [1, 1]} : vector<2x128xf32> to vector<2x32xf32>
    %129 = math.tanh %128 : vector<2x32xf32>
    %130 = arith.mulf %126, %78 : vector<2x32xf32>
    %131 = arith.mulf %125, %129 : vector<2x32xf32>
    %132 = arith.addf %130, %131 : vector<2x32xf32>
    %133 = math.tanh %132 : vector<2x32xf32>
    %134 = arith.mulf %127, %133 : vector<2x32xf32>
    %cst_39 = arith.constant dense<0.000000e+00> : vector<2x256xf32>
    %135 = tpu.matmul %134, %2, %cst_39 {dimension_numbers = #tpu.dot_dimension_numbers<[1], [0], [0], [1], [0, 0, 1, 1], [], []>} : vector<2x32xf32>, vector<32x256xf32>, vector<2x256xf32> -> vector<2x256xf32>
    %cst_40 = arith.constant dense<0.000000e+00> : vector<2x32xf32>
    %136 = tpu.matmul %132, %3, %cst_40 {dimension_numbers = #tpu.dot_dimension_numbers<[1], [0], [0], [1], [0, 0, 1, 1], [], []>} : vector<2x32xf32>, vector<32x32xf32>, vector<2x32xf32> -> vector<2x32xf32>
    %137 = vector.extract_strided_slice %135 {offsets = [0, 0], sizes = [2, 32], strides = [1, 1]} : vector<2x256xf32> to vector<2x32xf32>
    %138 = arith.addf %137, %136 : vector<2x32xf32>
    %139 = vector.extract_strided_slice %135 {offsets = [0, 128], sizes = [2, 128], strides = [1, 1]} : vector<2x256xf32> to vector<2x128xf32>
    %140 = vector.shape_cast %138 : vector<2x32xf32> to vector<2x1x32xf32>
    %141 = vector.broadcast %140 : vector<2x1x32xf32> to vector<2x8x32xf32>
    %142 = arith.addf %20, %141 : vector<2x8x32xf32>
    %143 = math.tanh %142 : vector<2x8x32xf32>
    %144 = vector.shape_cast %6 : vector<1x32xf32> to vector<1x1x32xf32>
    %145 = vector.broadcast %144 : vector<1x1x32xf32> to vector<2x8x32xf32>
    %146 = arith.mulf %143, %145 : vector<2x8x32xf32>
    %cst_41 = arith.constant dense<0.000000e+00> : vector<2x8xf32>
    %147 = vector.multi_reduction <add>, %146, %cst_41 [2] : vector<2x8x32xf32> to vector<2x8xf32>
    %cst_42 = arith.constant dense<0xFF800000> : vector<2xf32>
    %148 = vector.multi_reduction <maximumf>, %147, %cst_42 [1] : vector<2x8xf32> to vector<2xf32>
    %149 = vector.shape_cast %148 : vector<2xf32> to vector<2x1xf32>
    %150 = vector.broadcast %149 : vector<2x1xf32> to vector<2x8xf32>
    %151 = arith.subf %147, %150 : vector<2x8xf32>
    %152 = math.exp %151 : vector<2x8xf32>
    %cst_43 = arith.constant dense<0.000000e+00> : vector<2xf32>
    %153 = vector.multi_reduction <add>, %152, %cst_43 [1] : vector<2x8xf32> to vector<2xf32>
    %154 = vector.shape_cast %153 : vector<2xf32> to vector<2x1xf32>
    %155 = tpu.reciprocal %154 {approx = true} : vector<2x1xf32> -> vector<2x1xf32>
    %156 = vector.broadcast %155 : vector<2x1xf32> to vector<2x8xf32>
    %157 = arith.mulf %152, %156 : vector<2x8xf32>
    %158 = vector.shape_cast %157 : vector<2x8xf32> to vector<2x8x1xf32>
    %159 = vector.broadcast %158 : vector<2x8x1xf32> to vector<2x8x32xf32>
    %160 = arith.mulf %159, %0 : vector<2x8x32xf32>
    %cst_44 = arith.constant dense<0.000000e+00> : vector<2x32xf32>
    %161 = vector.multi_reduction <add>, %160, %cst_44 [1] : vector<2x8x32xf32> to vector<2x32xf32>
    %162 = vector.broadcast %9 : vector<1x32xf32> to vector<2x32xf32>
    %163 = arith.mulf %161, %162 : vector<2x32xf32>
    %cst_45 = arith.constant dense<0.000000e+00> : vector<2xf32>
    %164 = vector.multi_reduction <add>, %163, %cst_45 [1] : vector<2x32xf32> to vector<2xf32>
    %165 = vector.shape_cast %164 : vector<2xf32> to vector<2x1xf32>
    %166 = vector.extract_strided_slice %24 {offsets = [0, 2], sizes = [2, 1], strides = [1, 1]} : vector<2x8xf32> to vector<2x1xf32>
    %167 = arith.addf %165, %166 : vector<2x1xf32>
    %168 = vector.broadcast %167 : vector<2x1xf32> to vector<2x128xf32>
    %169 = vector.broadcast %7 : vector<1x128xf32> to vector<2x128xf32>
    %170 = arith.mulf %168, %169 : vector<2x128xf32>
    %171 = arith.addf %139, %170 : vector<2x128xf32>
    %172 = vector.broadcast %8 : vector<1x128xf32> to vector<2x128xf32>
    %173 = arith.addf %171, %172 : vector<2x128xf32>
    %174 = arith.negf %173 : vector<2x128xf32>
    %175 = math.exp %174 : vector<2x128xf32>
    %cst_46 = arith.constant 1.000000e+00 : f32
    %176 = vector.broadcast %cst_46 : f32 to vector<2x128xf32>
    %177 = arith.addf %176, %175 : vector<2x128xf32>
    %178 = arith.divf %176, %177 : vector<2x128xf32>
    %179 = vector.extract_strided_slice %178 {offsets = [0, 0], sizes = [2, 32], strides = [1, 1]} : vector<2x128xf32> to vector<2x32xf32>
    %180 = vector.extract_strided_slice %178 {offsets = [0, 32], sizes = [2, 32], strides = [1, 1]} : vector<2x128xf32> to vector<2x32xf32>
    %181 = vector.extract_strided_slice %178 {offsets = [0, 96], sizes = [2, 32], strides = [1, 1]} : vector<2x128xf32> to vector<2x32xf32>
    %182 = vector.extract_strided_slice %173 {offsets = [0, 64], sizes = [2, 32], strides = [1, 1]} : vector<2x128xf32> to vector<2x32xf32>
    %183 = math.tanh %182 : vector<2x32xf32>
    %184 = arith.mulf %180, %132 : vector<2x32xf32>
    %185 = arith.mulf %179, %183 : vector<2x32xf32>
    %186 = arith.addf %184, %185 : vector<2x32xf32>
    %187 = math.tanh %186 : vector<2x32xf32>
    %188 = arith.mulf %181, %187 : vector<2x32xf32>
    %cst_47 = arith.constant dense<0.000000e+00> : vector<2x256xf32>
    %189 = tpu.matmul %188, %2, %cst_47 {dimension_numbers = #tpu.dot_dimension_numbers<[1], [0], [0], [1], [0, 0, 1, 1], [], []>} : vector<2x32xf32>, vector<32x256xf32>, vector<2x256xf32> -> vector<2x256xf32>
    %cst_48 = arith.constant dense<0.000000e+00> : vector<2x32xf32>
    %190 = tpu.matmul %186, %3, %cst_48 {dimension_numbers = #tpu.dot_dimension_numbers<[1], [0], [0], [1], [0, 0, 1, 1], [], []>} : vector<2x32xf32>, vector<32x32xf32>, vector<2x32xf32> -> vector<2x32xf32>
    %191 = vector.extract_strided_slice %189 {offsets = [0, 0], sizes = [2, 32], strides = [1, 1]} : vector<2x256xf32> to vector<2x32xf32>
    %192 = arith.addf %191, %190 : vector<2x32xf32>
    %193 = vector.extract_strided_slice %189 {offsets = [0, 128], sizes = [2, 128], strides = [1, 1]} : vector<2x256xf32> to vector<2x128xf32>
    %194 = vector.shape_cast %192 : vector<2x32xf32> to vector<2x1x32xf32>
    %195 = vector.broadcast %194 : vector<2x1x32xf32> to vector<2x8x32xf32>
    %196 = arith.addf %20, %195 : vector<2x8x32xf32>
    %197 = math.tanh %196 : vector<2x8x32xf32>
    %198 = vector.shape_cast %6 : vector<1x32xf32> to vector<1x1x32xf32>
    %199 = vector.broadcast %198 : vector<1x1x32xf32> to vector<2x8x32xf32>
    %200 = arith.mulf %197, %199 : vector<2x8x32xf32>
    %cst_49 = arith.constant dense<0.000000e+00> : vector<2x8xf32>
    %201 = vector.multi_reduction <add>, %200, %cst_49 [2] : vector<2x8x32xf32> to vector<2x8xf32>
    %cst_50 = arith.constant dense<0xFF800000> : vector<2xf32>
    %202 = vector.multi_reduction <maximumf>, %201, %cst_50 [1] : vector<2x8xf32> to vector<2xf32>
    %203 = vector.shape_cast %202 : vector<2xf32> to vector<2x1xf32>
    %204 = vector.broadcast %203 : vector<2x1xf32> to vector<2x8xf32>
    %205 = arith.subf %201, %204 : vector<2x8xf32>
    %206 = math.exp %205 : vector<2x8xf32>
    %cst_51 = arith.constant dense<0.000000e+00> : vector<2xf32>
    %207 = vector.multi_reduction <add>, %206, %cst_51 [1] : vector<2x8xf32> to vector<2xf32>
    %208 = vector.shape_cast %207 : vector<2xf32> to vector<2x1xf32>
    %209 = tpu.reciprocal %208 {approx = true} : vector<2x1xf32> -> vector<2x1xf32>
    %210 = vector.broadcast %209 : vector<2x1xf32> to vector<2x8xf32>
    %211 = arith.mulf %206, %210 : vector<2x8xf32>
    %212 = vector.shape_cast %211 : vector<2x8xf32> to vector<2x8x1xf32>
    %213 = vector.broadcast %212 : vector<2x8x1xf32> to vector<2x8x32xf32>
    %214 = arith.mulf %213, %0 : vector<2x8x32xf32>
    %cst_52 = arith.constant dense<0.000000e+00> : vector<2x32xf32>
    %215 = vector.multi_reduction <add>, %214, %cst_52 [1] : vector<2x8x32xf32> to vector<2x32xf32>
    %216 = vector.broadcast %9 : vector<1x32xf32> to vector<2x32xf32>
    %217 = arith.mulf %215, %216 : vector<2x32xf32>
    %cst_53 = arith.constant dense<0.000000e+00> : vector<2xf32>
    %218 = vector.multi_reduction <add>, %217, %cst_53 [1] : vector<2x32xf32> to vector<2xf32>
    %219 = vector.shape_cast %218 : vector<2xf32> to vector<2x1xf32>
    %220 = vector.extract_strided_slice %24 {offsets = [0, 3], sizes = [2, 1], strides = [1, 1]} : vector<2x8xf32> to vector<2x1xf32>
    %221 = arith.addf %219, %220 : vector<2x1xf32>
    %222 = vector.broadcast %221 : vector<2x1xf32> to vector<2x128xf32>
    %223 = vector.broadcast %7 : vector<1x128xf32> to vector<2x128xf32>
    %224 = arith.mulf %222, %223 : vector<2x128xf32>
    %225 = arith.addf %193, %224 : vector<2x128xf32>
    %226 = vector.broadcast %8 : vector<1x128xf32> to vector<2x128xf32>
    %227 = arith.addf %225, %226 : vector<2x128xf32>
    %228 = arith.negf %227 : vector<2x128xf32>
    %229 = math.exp %228 : vector<2x128xf32>
    %cst_54 = arith.constant 1.000000e+00 : f32
    %230 = vector.broadcast %cst_54 : f32 to vector<2x128xf32>
    %231 = arith.addf %230, %229 : vector<2x128xf32>
    %232 = arith.divf %230, %231 : vector<2x128xf32>
    %233 = vector.extract_strided_slice %232 {offsets = [0, 0], sizes = [2, 32], strides = [1, 1]} : vector<2x128xf32> to vector<2x32xf32>
    %234 = vector.extract_strided_slice %232 {offsets = [0, 32], sizes = [2, 32], strides = [1, 1]} : vector<2x128xf32> to vector<2x32xf32>
    %235 = vector.extract_strided_slice %232 {offsets = [0, 96], sizes = [2, 32], strides = [1, 1]} : vector<2x128xf32> to vector<2x32xf32>
    %236 = vector.extract_strided_slice %227 {offsets = [0, 64], sizes = [2, 32], strides = [1, 1]} : vector<2x128xf32> to vector<2x32xf32>
    %237 = math.tanh %236 : vector<2x32xf32>
    %238 = arith.mulf %234, %186 : vector<2x32xf32>
    %239 = arith.mulf %233, %237 : vector<2x32xf32>
    %240 = arith.addf %238, %239 : vector<2x32xf32>
    %241 = math.tanh %240 : vector<2x32xf32>
    %242 = arith.mulf %235, %241 : vector<2x32xf32>
    %cst_55 = arith.constant dense<0.000000e+00> : vector<2x256xf32>
    %243 = tpu.matmul %242, %2, %cst_55 {dimension_numbers = #tpu.dot_dimension_numbers<[1], [0], [0], [1], [0, 0, 1, 1], [], []>} : vector<2x32xf32>, vector<32x256xf32>, vector<2x256xf32> -> vector<2x256xf32>
    %cst_56 = arith.constant dense<0.000000e+00> : vector<2x32xf32>
    %244 = tpu.matmul %240, %3, %cst_56 {dimension_numbers = #tpu.dot_dimension_numbers<[1], [0], [0], [1], [0, 0, 1, 1], [], []>} : vector<2x32xf32>, vector<32x32xf32>, vector<2x32xf32> -> vector<2x32xf32>
    %245 = vector.extract_strided_slice %243 {offsets = [0, 0], sizes = [2, 32], strides = [1, 1]} : vector<2x256xf32> to vector<2x32xf32>
    %246 = arith.addf %245, %244 : vector<2x32xf32>
    %247 = vector.extract_strided_slice %243 {offsets = [0, 128], sizes = [2, 128], strides = [1, 1]} : vector<2x256xf32> to vector<2x128xf32>
    %248 = vector.shape_cast %246 : vector<2x32xf32> to vector<2x1x32xf32>
    %249 = vector.broadcast %248 : vector<2x1x32xf32> to vector<2x8x32xf32>
    %250 = arith.addf %20, %249 : vector<2x8x32xf32>
    %251 = math.tanh %250 : vector<2x8x32xf32>
    %252 = vector.shape_cast %6 : vector<1x32xf32> to vector<1x1x32xf32>
    %253 = vector.broadcast %252 : vector<1x1x32xf32> to vector<2x8x32xf32>
    %254 = arith.mulf %251, %253 : vector<2x8x32xf32>
    %cst_57 = arith.constant dense<0.000000e+00> : vector<2x8xf32>
    %255 = vector.multi_reduction <add>, %254, %cst_57 [2] : vector<2x8x32xf32> to vector<2x8xf32>
    %cst_58 = arith.constant dense<0xFF800000> : vector<2xf32>
    %256 = vector.multi_reduction <maximumf>, %255, %cst_58 [1] : vector<2x8xf32> to vector<2xf32>
    %257 = vector.shape_cast %256 : vector<2xf32> to vector<2x1xf32>
    %258 = vector.broadcast %257 : vector<2x1xf32> to vector<2x8xf32>
    %259 = arith.subf %255, %258 : vector<2x8xf32>
    %260 = math.exp %259 : vector<2x8xf32>
    %cst_59 = arith.constant dense<0.000000e+00> : vector<2xf32>
    %261 = vector.multi_reduction <add>, %260, %cst_59 [1] : vector<2x8xf32> to vector<2xf32>
    %262 = vector.shape_cast %261 : vector<2xf32> to vector<2x1xf32>
    %263 = tpu.reciprocal %262 {approx = true} : vector<2x1xf32> -> vector<2x1xf32>
    %264 = vector.broadcast %263 : vector<2x1xf32> to vector<2x8xf32>
    %265 = arith.mulf %260, %264 : vector<2x8xf32>
    %266 = vector.shape_cast %265 : vector<2x8xf32> to vector<2x8x1xf32>
    %267 = vector.broadcast %266 : vector<2x8x1xf32> to vector<2x8x32xf32>
    %268 = arith.mulf %267, %0 : vector<2x8x32xf32>
    %cst_60 = arith.constant dense<0.000000e+00> : vector<2x32xf32>
    %269 = vector.multi_reduction <add>, %268, %cst_60 [1] : vector<2x8x32xf32> to vector<2x32xf32>
    %270 = vector.broadcast %9 : vector<1x32xf32> to vector<2x32xf32>
    %271 = arith.mulf %269, %270 : vector<2x32xf32>
    %cst_61 = arith.constant dense<0.000000e+00> : vector<2xf32>
    %272 = vector.multi_reduction <add>, %271, %cst_61 [1] : vector<2x32xf32> to vector<2xf32>
    %273 = vector.shape_cast %272 : vector<2xf32> to vector<2x1xf32>
    %274 = vector.extract_strided_slice %24 {offsets = [0, 4], sizes = [2, 1], strides = [1, 1]} : vector<2x8xf32> to vector<2x1xf32>
    %275 = arith.addf %273, %274 : vector<2x1xf32>
    %276 = vector.broadcast %275 : vector<2x1xf32> to vector<2x128xf32>
    %277 = vector.broadcast %7 : vector<1x128xf32> to vector<2x128xf32>
    %278 = arith.mulf %276, %277 : vector<2x128xf32>
    %279 = arith.addf %247, %278 : vector<2x128xf32>
    %280 = vector.broadcast %8 : vector<1x128xf32> to vector<2x128xf32>
    %281 = arith.addf %279, %280 : vector<2x128xf32>
    %282 = arith.negf %281 : vector<2x128xf32>
    %283 = math.exp %282 : vector<2x128xf32>
    %cst_62 = arith.constant 1.000000e+00 : f32
    %284 = vector.broadcast %cst_62 : f32 to vector<2x128xf32>
    %285 = arith.addf %284, %283 : vector<2x128xf32>
    %286 = arith.divf %284, %285 : vector<2x128xf32>
    %287 = vector.extract_strided_slice %286 {offsets = [0, 0], sizes = [2, 32], strides = [1, 1]} : vector<2x128xf32> to vector<2x32xf32>
    %288 = vector.extract_strided_slice %286 {offsets = [0, 32], sizes = [2, 32], strides = [1, 1]} : vector<2x128xf32> to vector<2x32xf32>
    %289 = vector.extract_strided_slice %286 {offsets = [0, 96], sizes = [2, 32], strides = [1, 1]} : vector<2x128xf32> to vector<2x32xf32>
    %290 = vector.extract_strided_slice %281 {offsets = [0, 64], sizes = [2, 32], strides = [1, 1]} : vector<2x128xf32> to vector<2x32xf32>
    %291 = math.tanh %290 : vector<2x32xf32>
    %292 = arith.mulf %288, %240 : vector<2x32xf32>
    %293 = arith.mulf %287, %291 : vector<2x32xf32>
    %294 = arith.addf %292, %293 : vector<2x32xf32>
    %295 = math.tanh %294 : vector<2x32xf32>
    %296 = arith.mulf %289, %295 : vector<2x32xf32>
    %cst_63 = arith.constant dense<0.000000e+00> : vector<2x256xf32>
    %297 = tpu.matmul %296, %2, %cst_63 {dimension_numbers = #tpu.dot_dimension_numbers<[1], [0], [0], [1], [0, 0, 1, 1], [], []>} : vector<2x32xf32>, vector<32x256xf32>, vector<2x256xf32> -> vector<2x256xf32>
    %cst_64 = arith.constant dense<0.000000e+00> : vector<2x32xf32>
    %298 = tpu.matmul %294, %3, %cst_64 {dimension_numbers = #tpu.dot_dimension_numbers<[1], [0], [0], [1], [0, 0, 1, 1], [], []>} : vector<2x32xf32>, vector<32x32xf32>, vector<2x32xf32> -> vector<2x32xf32>
    %299 = vector.extract_strided_slice %297 {offsets = [0, 0], sizes = [2, 32], strides = [1, 1]} : vector<2x256xf32> to vector<2x32xf32>
    %300 = arith.addf %299, %298 : vector<2x32xf32>
    %301 = vector.extract_strided_slice %297 {offsets = [0, 128], sizes = [2, 128], strides = [1, 1]} : vector<2x256xf32> to vector<2x128xf32>
    %302 = vector.shape_cast %300 : vector<2x32xf32> to vector<2x1x32xf32>
    %303 = vector.broadcast %302 : vector<2x1x32xf32> to vector<2x8x32xf32>
    %304 = arith.addf %20, %303 : vector<2x8x32xf32>
    %305 = math.tanh %304 : vector<2x8x32xf32>
    %306 = vector.shape_cast %6 : vector<1x32xf32> to vector<1x1x32xf32>
    %307 = vector.broadcast %306 : vector<1x1x32xf32> to vector<2x8x32xf32>
    %308 = arith.mulf %305, %307 : vector<2x8x32xf32>
    %cst_65 = arith.constant dense<0.000000e+00> : vector<2x8xf32>
    %309 = vector.multi_reduction <add>, %308, %cst_65 [2] : vector<2x8x32xf32> to vector<2x8xf32>
    %cst_66 = arith.constant dense<0xFF800000> : vector<2xf32>
    %310 = vector.multi_reduction <maximumf>, %309, %cst_66 [1] : vector<2x8xf32> to vector<2xf32>
    %311 = vector.shape_cast %310 : vector<2xf32> to vector<2x1xf32>
    %312 = vector.broadcast %311 : vector<2x1xf32> to vector<2x8xf32>
    %313 = arith.subf %309, %312 : vector<2x8xf32>
    %314 = math.exp %313 : vector<2x8xf32>
    %cst_67 = arith.constant dense<0.000000e+00> : vector<2xf32>
    %315 = vector.multi_reduction <add>, %314, %cst_67 [1] : vector<2x8xf32> to vector<2xf32>
    %316 = vector.shape_cast %315 : vector<2xf32> to vector<2x1xf32>
    %317 = tpu.reciprocal %316 {approx = true} : vector<2x1xf32> -> vector<2x1xf32>
    %318 = vector.broadcast %317 : vector<2x1xf32> to vector<2x8xf32>
    %319 = arith.mulf %314, %318 : vector<2x8xf32>
    %320 = vector.shape_cast %319 : vector<2x8xf32> to vector<2x8x1xf32>
    %321 = vector.broadcast %320 : vector<2x8x1xf32> to vector<2x8x32xf32>
    %322 = arith.mulf %321, %0 : vector<2x8x32xf32>
    %cst_68 = arith.constant dense<0.000000e+00> : vector<2x32xf32>
    %323 = vector.multi_reduction <add>, %322, %cst_68 [1] : vector<2x8x32xf32> to vector<2x32xf32>
    %324 = vector.broadcast %9 : vector<1x32xf32> to vector<2x32xf32>
    %325 = arith.mulf %323, %324 : vector<2x32xf32>
    %cst_69 = arith.constant dense<0.000000e+00> : vector<2xf32>
    %326 = vector.multi_reduction <add>, %325, %cst_69 [1] : vector<2x32xf32> to vector<2xf32>
    %327 = vector.shape_cast %326 : vector<2xf32> to vector<2x1xf32>
    %328 = vector.extract_strided_slice %24 {offsets = [0, 5], sizes = [2, 1], strides = [1, 1]} : vector<2x8xf32> to vector<2x1xf32>
    %329 = arith.addf %327, %328 : vector<2x1xf32>
    %330 = vector.broadcast %329 : vector<2x1xf32> to vector<2x128xf32>
    %331 = vector.broadcast %7 : vector<1x128xf32> to vector<2x128xf32>
    %332 = arith.mulf %330, %331 : vector<2x128xf32>
    %333 = arith.addf %301, %332 : vector<2x128xf32>
    %334 = vector.broadcast %8 : vector<1x128xf32> to vector<2x128xf32>
    %335 = arith.addf %333, %334 : vector<2x128xf32>
    %336 = arith.negf %335 : vector<2x128xf32>
    %337 = math.exp %336 : vector<2x128xf32>
    %cst_70 = arith.constant 1.000000e+00 : f32
    %338 = vector.broadcast %cst_70 : f32 to vector<2x128xf32>
    %339 = arith.addf %338, %337 : vector<2x128xf32>
    %340 = arith.divf %338, %339 : vector<2x128xf32>
    %341 = vector.extract_strided_slice %340 {offsets = [0, 0], sizes = [2, 32], strides = [1, 1]} : vector<2x128xf32> to vector<2x32xf32>
    %342 = vector.extract_strided_slice %340 {offsets = [0, 32], sizes = [2, 32], strides = [1, 1]} : vector<2x128xf32> to vector<2x32xf32>
    %343 = vector.extract_strided_slice %340 {offsets = [0, 96], sizes = [2, 32], strides = [1, 1]} : vector<2x128xf32> to vector<2x32xf32>
    %344 = vector.extract_strided_slice %335 {offsets = [0, 64], sizes = [2, 32], strides = [1, 1]} : vector<2x128xf32> to vector<2x32xf32>
    %345 = math.tanh %344 : vector<2x32xf32>
    %346 = arith.mulf %342, %294 : vector<2x32xf32>
    %347 = arith.mulf %341, %345 : vector<2x32xf32>
    %348 = arith.addf %346, %347 : vector<2x32xf32>
    %349 = math.tanh %348 : vector<2x32xf32>
    %350 = arith.mulf %343, %349 : vector<2x32xf32>
    %cst_71 = arith.constant dense<0.000000e+00> : vector<2x256xf32>
    %351 = tpu.matmul %350, %2, %cst_71 {dimension_numbers = #tpu.dot_dimension_numbers<[1], [0], [0], [1], [0, 0, 1, 1], [], []>} : vector<2x32xf32>, vector<32x256xf32>, vector<2x256xf32> -> vector<2x256xf32>
    %cst_72 = arith.constant dense<0.000000e+00> : vector<2x32xf32>
    %352 = tpu.matmul %348, %3, %cst_72 {dimension_numbers = #tpu.dot_dimension_numbers<[1], [0], [0], [1], [0, 0, 1, 1], [], []>} : vector<2x32xf32>, vector<32x32xf32>, vector<2x32xf32> -> vector<2x32xf32>
    %353 = vector.extract_strided_slice %351 {offsets = [0, 0], sizes = [2, 32], strides = [1, 1]} : vector<2x256xf32> to vector<2x32xf32>
    %354 = arith.addf %353, %352 : vector<2x32xf32>
    %355 = vector.extract_strided_slice %351 {offsets = [0, 128], sizes = [2, 128], strides = [1, 1]} : vector<2x256xf32> to vector<2x128xf32>
    %356 = vector.shape_cast %354 : vector<2x32xf32> to vector<2x1x32xf32>
    %357 = vector.broadcast %356 : vector<2x1x32xf32> to vector<2x8x32xf32>
    %358 = arith.addf %20, %357 : vector<2x8x32xf32>
    %359 = math.tanh %358 : vector<2x8x32xf32>
    %360 = vector.shape_cast %6 : vector<1x32xf32> to vector<1x1x32xf32>
    %361 = vector.broadcast %360 : vector<1x1x32xf32> to vector<2x8x32xf32>
    %362 = arith.mulf %359, %361 : vector<2x8x32xf32>
    %cst_73 = arith.constant dense<0.000000e+00> : vector<2x8xf32>
    %363 = vector.multi_reduction <add>, %362, %cst_73 [2] : vector<2x8x32xf32> to vector<2x8xf32>
    %cst_74 = arith.constant dense<0xFF800000> : vector<2xf32>
    %364 = vector.multi_reduction <maximumf>, %363, %cst_74 [1] : vector<2x8xf32> to vector<2xf32>
    %365 = vector.shape_cast %364 : vector<2xf32> to vector<2x1xf32>
    %366 = vector.broadcast %365 : vector<2x1xf32> to vector<2x8xf32>
    %367 = arith.subf %363, %366 : vector<2x8xf32>
    %368 = math.exp %367 : vector<2x8xf32>
    %cst_75 = arith.constant dense<0.000000e+00> : vector<2xf32>
    %369 = vector.multi_reduction <add>, %368, %cst_75 [1] : vector<2x8xf32> to vector<2xf32>
    %370 = vector.shape_cast %369 : vector<2xf32> to vector<2x1xf32>
    %371 = tpu.reciprocal %370 {approx = true} : vector<2x1xf32> -> vector<2x1xf32>
    %372 = vector.broadcast %371 : vector<2x1xf32> to vector<2x8xf32>
    %373 = arith.mulf %368, %372 : vector<2x8xf32>
    %374 = vector.shape_cast %373 : vector<2x8xf32> to vector<2x8x1xf32>
    %375 = vector.broadcast %374 : vector<2x8x1xf32> to vector<2x8x32xf32>
    %376 = arith.mulf %375, %0 : vector<2x8x32xf32>
    %cst_76 = arith.constant dense<0.000000e+00> : vector<2x32xf32>
    %377 = vector.multi_reduction <add>, %376, %cst_76 [1] : vector<2x8x32xf32> to vector<2x32xf32>
    %378 = vector.broadcast %9 : vector<1x32xf32> to vector<2x32xf32>
    %379 = arith.mulf %377, %378 : vector<2x32xf32>
    %cst_77 = arith.constant dense<0.000000e+00> : vector<2xf32>
    %380 = vector.multi_reduction <add>, %379, %cst_77 [1] : vector<2x32xf32> to vector<2xf32>
    %381 = vector.shape_cast %380 : vector<2xf32> to vector<2x1xf32>
    %382 = vector.extract_strided_slice %24 {offsets = [0, 6], sizes = [2, 1], strides = [1, 1]} : vector<2x8xf32> to vector<2x1xf32>
    %383 = arith.addf %381, %382 : vector<2x1xf32>
    %384 = vector.broadcast %383 : vector<2x1xf32> to vector<2x128xf32>
    %385 = vector.broadcast %7 : vector<1x128xf32> to vector<2x128xf32>
    %386 = arith.mulf %384, %385 : vector<2x128xf32>
    %387 = arith.addf %355, %386 : vector<2x128xf32>
    %388 = vector.broadcast %8 : vector<1x128xf32> to vector<2x128xf32>
    %389 = arith.addf %387, %388 : vector<2x128xf32>
    %390 = arith.negf %389 : vector<2x128xf32>
    %391 = math.exp %390 : vector<2x128xf32>
    %cst_78 = arith.constant 1.000000e+00 : f32
    %392 = vector.broadcast %cst_78 : f32 to vector<2x128xf32>
    %393 = arith.addf %392, %391 : vector<2x128xf32>
    %394 = arith.divf %392, %393 : vector<2x128xf32>
    %395 = vector.extract_strided_slice %394 {offsets = [0, 0], sizes = [2, 32], strides = [1, 1]} : vector<2x128xf32> to vector<2x32xf32>
    %396 = vector.extract_strided_slice %394 {offsets = [0, 32], sizes = [2, 32], strides = [1, 1]} : vector<2x128xf32> to vector<2x32xf32>
    %397 = vector.extract_strided_slice %394 {offsets = [0, 96], sizes = [2, 32], strides = [1, 1]} : vector<2x128xf32> to vector<2x32xf32>
    %398 = vector.extract_strided_slice %389 {offsets = [0, 64], sizes = [2, 32], strides = [1, 1]} : vector<2x128xf32> to vector<2x32xf32>
    %399 = math.tanh %398 : vector<2x32xf32>
    %400 = arith.mulf %396, %348 : vector<2x32xf32>
    %401 = arith.mulf %395, %399 : vector<2x32xf32>
    %402 = arith.addf %400, %401 : vector<2x32xf32>
    %403 = math.tanh %402 : vector<2x32xf32>
    %404 = arith.mulf %397, %403 : vector<2x32xf32>
    %cst_79 = arith.constant dense<0.000000e+00> : vector<2x256xf32>
    %405 = tpu.matmul %404, %2, %cst_79 {dimension_numbers = #tpu.dot_dimension_numbers<[1], [0], [0], [1], [0, 0, 1, 1], [], []>} : vector<2x32xf32>, vector<32x256xf32>, vector<2x256xf32> -> vector<2x256xf32>
    %cst_80 = arith.constant dense<0.000000e+00> : vector<2x32xf32>
    %406 = tpu.matmul %402, %3, %cst_80 {dimension_numbers = #tpu.dot_dimension_numbers<[1], [0], [0], [1], [0, 0, 1, 1], [], []>} : vector<2x32xf32>, vector<32x32xf32>, vector<2x32xf32> -> vector<2x32xf32>
    %407 = vector.extract_strided_slice %405 {offsets = [0, 0], sizes = [2, 32], strides = [1, 1]} : vector<2x256xf32> to vector<2x32xf32>
    %408 = arith.addf %407, %406 : vector<2x32xf32>
    %409 = vector.extract_strided_slice %405 {offsets = [0, 128], sizes = [2, 128], strides = [1, 1]} : vector<2x256xf32> to vector<2x128xf32>
    %410 = vector.shape_cast %408 : vector<2x32xf32> to vector<2x1x32xf32>
    %411 = vector.broadcast %410 : vector<2x1x32xf32> to vector<2x8x32xf32>
    %412 = arith.addf %20, %411 : vector<2x8x32xf32>
    %413 = math.tanh %412 : vector<2x8x32xf32>
    %414 = vector.shape_cast %6 : vector<1x32xf32> to vector<1x1x32xf32>
    %415 = vector.broadcast %414 : vector<1x1x32xf32> to vector<2x8x32xf32>
    %416 = arith.mulf %413, %415 : vector<2x8x32xf32>
    %cst_81 = arith.constant dense<0.000000e+00> : vector<2x8xf32>
    %417 = vector.multi_reduction <add>, %416, %cst_81 [2] : vector<2x8x32xf32> to vector<2x8xf32>
    %cst_82 = arith.constant dense<0xFF800000> : vector<2xf32>
    %418 = vector.multi_reduction <maximumf>, %417, %cst_82 [1] : vector<2x8xf32> to vector<2xf32>
    %419 = vector.shape_cast %418 : vector<2xf32> to vector<2x1xf32>
    %420 = vector.broadcast %419 : vector<2x1xf32> to vector<2x8xf32>
    %421 = arith.subf %417, %420 : vector<2x8xf32>
    %422 = math.exp %421 : vector<2x8xf32>
    %cst_83 = arith.constant dense<0.000000e+00> : vector<2xf32>
    %423 = vector.multi_reduction <add>, %422, %cst_83 [1] : vector<2x8xf32> to vector<2xf32>
    %424 = vector.shape_cast %423 : vector<2xf32> to vector<2x1xf32>
    %425 = tpu.reciprocal %424 {approx = true} : vector<2x1xf32> -> vector<2x1xf32>
    %426 = vector.broadcast %425 : vector<2x1xf32> to vector<2x8xf32>
    %427 = arith.mulf %422, %426 : vector<2x8xf32>
    %428 = vector.shape_cast %427 : vector<2x8xf32> to vector<2x8x1xf32>
    %429 = vector.broadcast %428 : vector<2x8x1xf32> to vector<2x8x32xf32>
    %430 = arith.mulf %429, %0 : vector<2x8x32xf32>
    %cst_84 = arith.constant dense<0.000000e+00> : vector<2x32xf32>
    %431 = vector.multi_reduction <add>, %430, %cst_84 [1] : vector<2x8x32xf32> to vector<2x32xf32>
    %432 = vector.broadcast %9 : vector<1x32xf32> to vector<2x32xf32>
    %433 = arith.mulf %431, %432 : vector<2x32xf32>
    %cst_85 = arith.constant dense<0.000000e+00> : vector<2xf32>
    %434 = vector.multi_reduction <add>, %433, %cst_85 [1] : vector<2x32xf32> to vector<2xf32>
    %435 = vector.shape_cast %434 : vector<2xf32> to vector<2x1xf32>
    %436 = vector.extract_strided_slice %24 {offsets = [0, 7], sizes = [2, 1], strides = [1, 1]} : vector<2x8xf32> to vector<2x1xf32>
    %437 = arith.addf %435, %436 : vector<2x1xf32>
    %438 = vector.broadcast %437 : vector<2x1xf32> to vector<2x128xf32>
    %439 = vector.broadcast %7 : vector<1x128xf32> to vector<2x128xf32>
    %440 = arith.mulf %438, %439 : vector<2x128xf32>
    %441 = arith.addf %409, %440 : vector<2x128xf32>
    %442 = vector.broadcast %8 : vector<1x128xf32> to vector<2x128xf32>
    %443 = arith.addf %441, %442 : vector<2x128xf32>
    %444 = arith.negf %443 : vector<2x128xf32>
    %445 = math.exp %444 : vector<2x128xf32>
    %cst_86 = arith.constant 1.000000e+00 : f32
    %446 = vector.broadcast %cst_86 : f32 to vector<2x128xf32>
    %447 = arith.addf %446, %445 : vector<2x128xf32>
    %448 = arith.divf %446, %447 : vector<2x128xf32>
    %449 = vector.extract_strided_slice %448 {offsets = [0, 0], sizes = [2, 32], strides = [1, 1]} : vector<2x128xf32> to vector<2x32xf32>
    %450 = vector.extract_strided_slice %448 {offsets = [0, 32], sizes = [2, 32], strides = [1, 1]} : vector<2x128xf32> to vector<2x32xf32>
    %451 = vector.extract_strided_slice %448 {offsets = [0, 96], sizes = [2, 32], strides = [1, 1]} : vector<2x128xf32> to vector<2x32xf32>
    %452 = vector.extract_strided_slice %443 {offsets = [0, 64], sizes = [2, 32], strides = [1, 1]} : vector<2x128xf32> to vector<2x32xf32>
    %453 = math.tanh %452 : vector<2x32xf32>
    %454 = arith.mulf %450, %402 : vector<2x32xf32>
    %455 = arith.mulf %449, %453 : vector<2x32xf32>
    %456 = arith.addf %454, %455 : vector<2x32xf32>
    %457 = math.tanh %456 : vector<2x32xf32>
    %458 = arith.mulf %451, %457 : vector<2x32xf32>
    %459 = vector.broadcast %10 : vector<1x32xf32> to vector<2x32xf32>
    %460 = arith.mulf %458, %459 : vector<2x32xf32>
    %cst_87 = arith.constant dense<0.000000e+00> : vector<2xf32>
    %461 = vector.multi_reduction <add>, %460, %cst_87 [1] : vector<2x32xf32> to vector<2xf32>
    %462 = vector.shape_cast %461 : vector<2xf32> to vector<2x1xf32>
    %463 = vector.broadcast %11 : vector<1x32xf32> to vector<2x32xf32>
    %464 = arith.mulf %431, %463 : vector<2x32xf32>
    %cst_88 = arith.constant dense<0.000000e+00> : vector<2xf32>
    %465 = vector.multi_reduction <add>, %464, %cst_88 [1] : vector<2x32xf32> to vector<2xf32>
    %466 = vector.shape_cast %465 : vector<2xf32> to vector<2x1xf32>
    %467 = arith.addf %462, %466 : vector<2x1xf32>
    %468 = vector.broadcast %14 : vector<1x1xf32> to vector<2x1xf32>
    %469 = arith.addf %467, %468 : vector<2x1xf32>
    %c0_89 = arith.constant 0 : index
    %c0_90 = arith.constant 0 : index
    %470 = vector.load %arg5[%c0_89, %c0_90] : memref<2x1xf32, #tpu.memory_space<vmem>>, vector<2x1xf32>
    tpu.vector_store %arg5[%c0_89, %c0_90], %469 {strides = array<i32>} : memref<2x1xf32, #tpu.memory_space<vmem>>, vector<2x1xf32>,
    return
  }
  func.func @transform_0(%arg0: i32) -> (i32, i32, i32) {
    %c0_i32 = arith.constant 0 : i32
    %c0_i32_0 = arith.constant 0 : i32
    %c0_i32_1 = arith.constant 0 : i32
    return %arg0, %c0_i32, %c0_i32_0 : i32, i32, i32
  }
  func.func @transform_1(%arg0: i32) -> (i32, i32) {
    %c0_i32 = arith.constant 0 : i32
    %c0_i32_0 = arith.constant 0 : i32
    return %arg0, %c0_i32 : i32, i32
  }
  func.func @transform_2(%arg0: i32) -> (i32, i32) {
    %c0_i32 = arith.constant 0 : i32
    %c0_i32_0 = arith.constant 0 : i32
    %c0_i32_1 = arith.constant 0 : i32
    return %c0_i32, %c0_i32_0 : i32, i32
  }
  func.func @transform_3(%arg0: i32) -> (i32, i32) {
    %c0_i32 = arith.constant 0 : i32
    %c0_i32_0 = arith.constant 0 : i32
    %c0_i32_1 = arith.constant 0 : i32
    return %c0_i32, %c0_i32_0 : i32, i32
  }
  func.func @transform_4(%arg0: i32) -> (i32, i32) {
    %c0_i32 = arith.constant 0 : i32
    %c0_i32_0 = arith.constant 0 : i32
    return %arg0, %c0_i32 : i32, i32
  }
}

</mosaic_0001>

<bundles_post_ra>
// kernel: decoder_forward.1
= control target key start
LH: loop header
LB: loop body
LE: loop exit
PB: predicated region body
PF: predicated region fallthrough
CT: control target
= control target key end

     0   :  { %9 = vsyncpa [#allocation3], 0  ;;  %s2760_s0 = inlined_call_operand.hbm [shape: f32[2,8,32], index: 0, kind: input, shape index: {}]   ;;  %s2761_s1 = inlined_call_operand.hbm [shape: f32[2,8], index: 1, kind: input, shape index: {}]   ;;  %s2762_s2 = inlined_call_operand.hbm [shape: f32[96,256], index: 2, kind: input, shape index: {}]   ;;  %s2763_s3 = inlined_call_operand.hbm [shape: f32[8,256], index: 3, kind: input, shape index: {}]   ;;  %s2764_s4 = inlined_call_operand.vmem [shape: f32[2,1], index: 4, kind: output, shape index: {}]  }
   0x1   :  { %10 = vsyncpa [#allocation5], 0  ;;  %s30_s17 = sshll.u32 %s2761_s1, 4  ;;  %s31_s17 = int_to_ptr.hbm [resolvable:$true] %s30_s17 }
   0x2   :  { %11 = vsyncpa [#allocation8], 0  ;;  %s2231_s18 = smov [#allocation4]   ;;  %s16_s22 = sshll.u32 %s2760_s0, 4  ;;  %s17_s22 = int_to_ptr.hbm [resolvable:$true] %s16_s22 }
   0x3   :  { %s32_s19 = sshll.u32 %s2231_s18, 4  ;;  %s2232_s23 = smov [#allocation2]   ;;  %s33_s19 = int_to_ptr.vmem [resolvable:$true] %s32_s19 }
   0x4   :  { %35 = dma.hbm_to_vmem [thread:$0]  %s31_s17, 32, %s33_s19, [#allocation5]  }
   0x5   :  { %s18_s24 = sshll.u32 %s2232_s23, 4  ;;  %s2233_s25 = smov 128   ;;  %s19_s24 = int_to_ptr.vmem [resolvable:$true] %s18_s24 }
   0x6   :  { %s2234_s26 = smov 8   ;;  %s40_s1 = sshll.u32 %s2762_s2, 4  ;;  %s41_s1 = int_to_ptr.hbm [resolvable:$true] %s40_s1 }
   0x7   :  { %24 = dma.hbm_to_vmem [thread:$0]  %s17_s22, 256, %s19_s24, [#allocation3], %s2233_s25, %s2233_s25, %s2234_s26  }
   0x8   :  { %s2235_s29 = smov [#allocation6]   ;;  %s54_s0 = sshll.u32 %s2763_s3, 4  ;;  %s55_s0 = int_to_ptr.hbm [resolvable:$true] %s54_s0 }
   0x9   :  { %s42_s30 = sshll.u32 %s2235_s29, 4  ;;  %s2236_s7 = smov 256   ;;  %s43_s30 = int_to_ptr.vmem [resolvable:$true] %s42_s30 }
   0xa   :  { %s2237_s8 = smov 16   ;;  %s2238_s9 = smov [#allocation7]  }
   0xb   :  { %48 = dma.hbm_to_vmem [thread:$0]  %s41_s1, 3072, %s43_s30, [#allocation5], %s2236_s7, %s2236_s7, %s2237_s8  }
   0xc   :  { %s56_s10 = sshll.u32 %s2238_s9, 4  ;;  %s57_s10 = int_to_ptr.vmem [resolvable:$true] %s56_s10 }
   0xd   :  { %59 = dma.hbm_to_vmem [thread:$0]  %s55_s0, 256, %s57_s10, [#allocation8]  }
   0xe   :  { %2225 = dma.done.wait [#allocation3], 256  }
   0xf   :  { %2226 = vsyncadd [#allocation3], 4294967040 }
  0x10   :  { %2227 = dma.done.wait [#allocation5], 3104  }
  0x11   :  { %2228 = vsyncadd [#allocation5], 4294964192 }
  0x12   :  { %2229 = dma.done.wait [#allocation8], 256  }
  0x13   :  { %2230 = vsyncadd [#allocation8], 4294967040  ;;  %v2289_v0 = vld [vmem:[#allocation6 + $0x70] sm:$0xff]  ;;  %v2291_v2 = vld [vmem:[#allocation6 + $0x60] sm:$0xff]  ;;  %vm103_vm0 = vcmask 261120   ;;  %v2239_v12 = vmov 0.0   ;;  %v230_v36 = vlaneseq }
  0x14   :  { %v94_v1 = vld [vmem:[#allocation6 + $0xb0] sm:$0xff]  ;;  %201 = vmatpush.msra.mxu3 %v2289_v0  ;;  %v93_v3 = vld [vmem:[#allocation6 + $0xa0] sm:$0xff]  ;;  %vm234_vm1 = vcmask 1041409   ;;  %vm237_vm2 = vcmask 58368   ;;  %v2240_v43 = vmov 0   ;;  %vm308_vm3 = vcmask 254976  }
  0x15   :  { %122 = vmatpush.msra.mxu0 %v94_v1  ;;  %v2294_v4 = vld [vmem:[#allocation6 + $0x50] sm:$0xff]  ;;  %v2299_v7 = vld [vmem:[#allocation6 + $0x20] sm:$0xff]  ;;  %v2351_v37 = vand.u32 127, %v230_v36  ;;  %1946 = vset.pattern.permute.xlu2 %v2240_v43  ;;  %s2242_s2 = smov 64   ;;  %s2243_s3 = smov 32  }
  0x16   :  { %v92_v5 = vld [vmem:[#allocation6 + $0x90] sm:$0xff]  ;;  %202 = vmatpush.msra.mxu3 %v2291_v2  ;;  %v2302_v8 = vld [vmem:[#allocation6 + $0x40] sm:$0xff]  ;;  %1945 = vset.pattern.permute.xlu1 %v2240_v43  ;;  %s2244_s11 = smov 96   ;;  %s2251_s12 = smov 126  }
  0x17   :  { %v2296_v6 = vld [vmem:[#allocation6 + $0x30] sm:$0xff]  ;;  %123 = vmatpush.msra.mxu0 %v93_v3  ;;  %v91_v9 = vld [vmem:[#allocation6 + $0x80] sm:$0xff]  ;;  %1947 = vset.pattern.permute.xlu0 %v2240_v43 }
  0x18   :  { %161 = vmatpush.msra.mxu1 %v2296_v6  ;;  %203 = vmatpush.msra.mxu3 %v2294_v4  ;;  %v2305_v10 = vld [vmem:[#allocation2] sm:$0xff]  ;;  %v2314_v13 = vld [vmem:[#allocation6] sm:$0xff]  ;;  %v2323_v14 = vld [vmem:[#allocation2 + $0x8] sm:$0xff] }
  0x19   :  { %124 = vmatpush.msra.mxu0 %v92_v5  ;;  %v2308_v11 = vld [vmem:[#allocation6 + $0x10] sm:$0xff]  ;;  %v95_v16 = vld [vmem:[#allocation7] ss:$0 sm:$0xff]  ;;  %v2345_v28 = vld [vmem:[#allocation7 + $0x1] ss:$0 sm:$0xff]  ;;  %v2241_v5 = vmov 1  }
  0x1a   :  { %162 = vmatpush.msra.mxu1 %v2299_v7  ;;  %204 = vmatpush.msra.mxu3 %v2302_v8  ;;  %v102_v3 = vld [vmem:[#allocation7 + $0x7] ss:$0 sm:$0xff]  ;;  %v2399_v36 = vld [vmem:[#allocation7 + $0x4] ss:$0 sm:$0xff] }
  0x1b   :  { %125 = vmatpush.msra.mxu0 %v91_v9  ;;  %205 = vmatmul.f32.vlgmr.msra.gmra.mxu3 %v2239_v12  ;;  %v2366_v9 = vld [vmem:[#allocation6 + $0x38] sm:$0xff] }
  0x1c   :  { %1893 = vmatmul.msk.f32.vlgmr.msra.gmra.mxu0 %vm103_vm0, %v2305_v10  ;;  %163 = vmatpush.msra.mxu1 %v2308_v11 }
  0x1d   :  { %420 = vmatpush.msrb.mxu3 %v2289_v0  ;;  %589 = vmatpush.msrb.mxu0 %v2296_v6 }
  0x1e   :  { %164 = vmatpush.msra.mxu1 %v2314_v13  ;;  %181 = vmatpush.msra.mxu2 %v2366_v9 }
  0x1f   :  { %421 = vmatpush.msrb.mxu3 %v2291_v2  ;;  %165 = vmatmul.f32.vlgmr.msra.gmra.mxu1 %v2239_v12 }
  0x20   :  { %590 = vmatpush.msrb.mxu0 %v2299_v7  ;;  %375 = vmatpush.msrb.mxu1 %v2296_v6 }
  0x21   :  { %422 = vmatpush.msrb.mxu3 %v2294_v4 }
  0x22   :  { %591 = vmatpush.msrb.mxu0 %v2308_v11  ;;  %376 = vmatpush.msrb.mxu1 %v2299_v7 }
  0x23   :  { %423 = vmatpush.msrb.mxu3 %v2302_v8 }
  0x24   :  { %1894 = vmatmul.msk.f32.gmra.mxu0 %vm103_vm0, %v2323_v14  ;;  %377 = vmatpush.msrb.mxu1 %v2308_v11 }
  0x25   :  { %803 = vmatpush.msra.mxu3 %v2296_v6  ;;  %592 = vmatpush.msrb.mxu0 %v2314_v13 }
  0x26   :  { %378 = vmatpush.msrb.mxu1 %v2314_v13 }
  0x27   :  { %804 = vmatpush.msra.mxu3 %v2299_v7  ;;  %823 = vmatpush.msra.mxu0 %v2366_v9 }
  0x28   :  { %609 = vmatpush.msra.mxu1 %v2366_v9 }
  0x29   :  { %805 = vmatpush.msra.mxu3 %v2308_v11 }
  0x2b   :  { %806 = vmatpush.msra.mxu3 %v2314_v13 }
  0x99   :  { %v127_v15 = vpop.f32.mrf.mxu0 }
  0x9a   :  { %v2339_v19 = vadd.f32 %v127_v15, %v95_v16  ;;  %v2368_v15 = vld [vmem:[#allocation6 + $0x28] sm:$0xff] }
  0x9b   :  { %182 = vmatpush.msra.mxu2 %v2368_v15  ;;  %610 = vmatpush.msra.mxu1 %v2368_v15 }
  0x9c   :  { %v166_v17 = vpop.f32.mrf.mxu1  ;;  %824 = vmatpush.msra.mxu0 %v2368_v15 }
  0x9e   :  { %v206_v18 = vpop.f32.mrf.mxu3 }
  0x9f   :  { %v209_v20 = vadd.f32 %v206_v18, %v166_v17  ;;  %v2377_v17 = vld [vmem:[#allocation6 + $0x8] sm:$0xff] }
  0xa1   :  { %v130_v21 = vpop.f32.mrf.mxu0  ;;  %v211_v22 = vrot.slane %v209_v20, 1  ;;  %v212_v23 = vperm.slane %v209_v20, 0 }
  0xa2   :  { %v2341_v24 = vadd.f32 %v130_v21, %v95_v16  ;;  %v2372_v16 = vld [vmem:[#allocation6 + $0x18] sm:$0xff] }
  0xa3   :  { %v213_v25 = vperm.slane %v211_v22, 0  ;;  %v216_v26 = vadd.f32 %v212_v23, %v2339_v19  ;;  %183 = vmatpush.msra.mxu2 %v2372_v16  ;;  %611 = vmatpush.msra.mxu1 %v2372_v16 }
  0xa4   :  { %825 = vmatpush.msra.mxu0 %v2372_v16 }
  0xa5   :  { %1964 = vtanh.f32 %v216_v26  ;;  %v217_v27 = vadd.f32 %v213_v25, %v2341_v24  ;;  %184 = vmatpush.msra.mxu2 %v2377_v17  ;;  %612 = vmatpush.msra.mxu1 %v2377_v17 }
  0xa6   :  { %185 = vmatmul.f32.vlgmr.msra.gmra.mxu2 %v2239_v12  ;;  %826 = vmatpush.msra.mxu0 %v2377_v17 }
  0xa7   :  { %1966 = vtanh.f32 %v217_v27  ;;  %395 = vmatpush.msrb.mxu2 %v2366_v9 }
  0xa9   :  { %396 = vmatpush.msrb.mxu2 %v2368_v15 }
  0xab   :  { %v1965_v29 = vpop.eup %1964  ;;  %397 = vmatpush.msrb.mxu2 %v2372_v16 }
  0xac   :  { %v220_v30 = vmul.f32 %v1965_v29, %v2345_v28 }
  0xad   :  { %v1967_v32 = vpop.eup %1966  ;;  %398 = vmatpush.msrb.mxu2 %v2377_v17 }
  0xae   :  { %v222_v31 = vsel %vm103_vm0, %v220_v30, 0.0  ;;  %v221_v33 = vmul.f32 %v1967_v32, %v2345_v28 }
  0xaf   :  { %223 = vadd.xlane.f32.xlu0 %v222_v31  ;;  %634 = vmatpush.msra.mxu2 %v2289_v0 }
  0xb0   :  { %v225_v34 = vsel %vm103_vm0, %v221_v33, 0.0 }
  0xb1   :  { %635 = vmatpush.msra.mxu2 %v2291_v2 }
  0xb3   :  { %636 = vmatpush.msra.mxu2 %v2294_v4 }
  0xb5   :  { %637 = vmatpush.msra.mxu2 %v2302_v8 }
  0xb7   :  { %226 = vadd.xlane.f32.xlu0 %v225_v34 }
 0x122   :  { %v224_v35 = vpop.xlane.xlu0 %223 }
 0x123   :  { %v232_v39 = vperm.slane %v224_v35, %v2351_v37 }
 0x12a   :  { %v227_v38 = vpop.xlane.xlu0 %226 }
 0x12b   :  { %v233_v40 = vperm.slane %v227_v38, %v2351_v37 }
 0x12d   :  { %v235_v41 = vsel %vm234_vm1, %v233_v40, %v232_v39 }
 0x12e   :  { %v238_v42 = vsel %vm237_vm2, %v235_v41, -inf }
 0x12f   :  { %239 = vmax.xlane.f32.xlu1 %v238_v42 }
 0x1a2   :  { %v240_v44 = vpop.xlane.xlu1 %239 }
 0x1a3   :  { %v242_v45 = vperm.slane %v240_v44, 0  ;;  %v243_v46 = vperm.slane %v240_v44, 1 }
 0x1a5   :  { %v246_v47 = vsub.f32 %v224_v35, %v242_v45  ;;  %v247_v48 = vsub.f32 %v227_v38, %v243_v46 }
 0x1a7   :  { %v248_v49 = vmul.f32 1.442695, %v246_v47  ;;  %v250_v50 = vmul.f32 1.442695, %v247_v48  ;;  %v78_v47 = vld [vmem:[#allocation4] sm:$0x3] }
 0x1a9   :  { %1968 = vpow2.f32 %v248_v49 }
 0x1aa   :  { %1970 = vpow2.f32 %v250_v50 }
 0x1af   :  { %v1969_v51 = vpop.eup %1968 }
 0x1b0   :  { %v1971_v52 = vpop.eup %1970  ;;  %255 = vperm.xlu1 %1945, %v1969_v51  }
 0x1b1   :  { %258 = vperm.xlu2 %1946, %v1971_v52  }
 0x20b   :  { %v259_v53 = vpop.permute.xlu2 %258 }
 0x20c   :  { %v261_v55 = vperm.slane %v259_v53, %v2351_v37  ;;  %v2408_v53 = vld [vmem:[#allocation7 + $0x2] ss:$0 sm:$0xff] }
 0x222   :  { %v256_v54 = vpop.permute.xlu1 %255 }
 0x223   :  { %v260_v56 = vperm.slane %v256_v54, %v2351_v37 }
 0x225   :  { %v262_v57 = vsel %vm234_vm1, %v261_v55, %v260_v56  ;;  %v186_v55 = vpop.f32.mrf.mxu2 }
 0x226   :  { %v264_v58 = vsel %vm237_vm2, %v262_v57, 0.0  ;;  %v2411_v57 = vld [vmem:[#allocation7 + $0x3] ss:$0 sm:$0xff] }
 0x227   :  { %265 = vadd.xlane.f32.xlu2 %v264_v58 }
 0x29a   :  { %v266_v59 = vpop.xlane.xlu2 %265 }
 0x29b   :  { %1972 = vrcp.f32 %v266_v59 }
 0x2a1   :  { %v1973_v60 = vpop.eup %1972 }
 0x2a2   :  { %v270_v61 = vperm.slane %v1973_v60, 1  ;;  %v269_v62 = vperm.slane %v1973_v60, 0 }
 0x2a4   :  { %v274_v63 = vmul.f32 %v1971_v52, %v270_v61  ;;  %v273_v1 = vmul.f32 %v1969_v51, %v269_v62 }
 0x2a6   :  { %282 = vperm.xlu0 %1947, %v274_v63   ;;  %277 = vperm.xlu1 %1945, %v273_v1  }
 0x2ae   :  { %137 = vperm.xlu1 %1945, %v102_v3  }
 0x2b6   :  { %1948 = vset.pattern.permute.xlu1 %v2241_v5 }
 0x2b7   :  { %142 = vperm.xlu1 %1948, %v102_v3  }
 0x2bf   :  { %1949 = vset.pattern.permute.xlu1 %v2240_v43 }
 0x318   :  { %v283_v18 = vpop.permute.xlu0 %282  ;;  %v278_v20 = vpop.permute.xlu1 %277 }
 0x319   :  { %v286_v21 = vmul.f32 %v283_v18, %v2323_v14  ;;  %v285_v22 = vmul.f32 %v278_v20, %v2305_v10 }
 0x31b   :  { %v294_v23 = vsel %vm103_vm0, %v286_v21, 0.0  ;;  %v287_v25 = vsel %vm103_vm0, %v285_v22, 0.0 }
 0x31c   :  { %v295_v26 = vrot.slane %v294_v23, 4  ;;  %v288_v12 = vrot.slane %v287_v25, 4 }
 0x31e   :  { %v296_v27 = vadd.f32 %v295_v26, %v294_v23  ;;  %v289_v29 = vadd.f32 %v288_v12, %v287_v25 }
 0x320   :  { %v297_v30 = vrot.slane %v296_v27, 2  ;;  %v290_v31 = vrot.slane %v289_v29, 2  ;;  %v138_v46 = vpop.permute.xlu1 %137 }
 0x321   :  { %v140_v49 = vmul.f32 %v138_v46, %v78_v47 }
 0x322   :  { %v298_v32 = vadd.f32 %v297_v30, %v296_v27  ;;  %v291_v33 = vadd.f32 %v290_v31, %v289_v29 }
 0x324   :  { %v299_v34 = vrot.slane %v298_v32, 1  ;;  %v292_v35 = vrot.slane %v291_v33, 1 }
 0x326   :  { %v300_v38 = vadd.f32 %v299_v34, %v298_v32  ;;  %v293_v39 = vadd.f32 %v292_v35, %v291_v33 }
 0x328   :  { %v302_v40 = vmul.f32 %v300_v38, %v2399_v36  ;;  %v301_v41 = vmul.f32 %v293_v39, %v2399_v36 }
 0x329   :  { %v143_v48 = vpop.permute.xlu1 %142 }
 0x32a   :  { %v305_v42 = vrot.slane %v302_v40, 7  ;;  %v2405_v50 = vadd.f32 %v143_v48, %v140_v49 }
 0x32c   :  { %v306_v44 = vsel %vm234_vm1, %v305_v42, %v301_v41 }
 0x32d   :  { %v309_v45 = vsel %vm308_vm3, %v306_v44, 0.0 }
 0x32e   :  { %310 = vadd.xlane.f32.xlu2 %v309_v45 }
 0x3a1   :  { %v311_v51 = vpop.xlane.xlu2 %310 }
 0x3a2   :  { %v312_v52 = vadd.f32 %v311_v51, %v2405_v50 }
 0x3a4   :  { %315 = vperm.xlu0 %1947, %v312_v52  }
 0x416   :  { %v316_v54 = vpop.permute.xlu0 %315 }
 0x417   :  { %v318_v56 = vmul.f32 %v316_v54, %v2408_v53 }
 0x419   :  { %v319_v58 = vadd.f32 %v318_v56, %v186_v55 }
 0x41b   :  { %v320_v59 = vadd.f32 %v319_v58, %v2411_v57 }
 0x41d   :  { %1974 = vtanh.f32 %v320_v59  ;;  %v1895_v61 = vmul.f32 -1.442695, %v320_v59 }
 0x41f   :  { %1976 = vpow2.f32 %v1895_v61 }
 0x423   :  { %v1975_v60 = vpop.eup %1974 }
 0x424   :  { %343 = vrot.lane.b32.xlu1 %v1975_v60, %s2242_s2 }
 0x425   :  { %v1977_v62 = vpop.eup %1976 }
 0x426   :  { %v324_v63 = vadd.f32 1.0, %v1977_v62 }
 0x428   :  { %1978 = vrcp.f32 %v324_v63  ;;  %v336_v22 = vand.u32 2147483648, %v324_v63  ;;  %vm330_vm5 = vweird.f32 %v324_v63  ;;  %v334_v23 = vand.u32 2147483647, %v324_v63 }
 0x42a   :  { %v337_v26 = vor.u32 1.1754944e-38, %v336_v22  ;;  %vm335_vm7 = vcmp.eq.f32.partialorder %v334_v23, 8.507059e+37 }
 0x42e   :  { %v1979_v1 = vpop.eup %1978 }
 0x42f   :  { %v326_v3 = vmul.f32 %v1979_v1, %v324_v63  ;;  %vm331_vm4 = vweird.f32 %v1979_v1 }
 0x430   :  { %vm332_vm6 = vmor %vm330_vm5, %vm331_vm4 }
 0x431   :  { %v327_v18 = vsub.f32 1.0, %v326_v3 }
 0x433   :  { %v328_v20 = vmul.f32 %v1979_v1, %v327_v18 }
 0x435   :  { %v329_v21 = vadd.f32 %v1979_v1, %v328_v20 }
 0x437   :  { %v333_v25 = vsel %vm332_vm6, %v1979_v1, %v329_v21 }
 0x438   :  { %v338_v27 = vsel %vm335_vm7, %v337_v26, %v333_v25 }
 0x439   :  { %v341_v30 = vmul.f32 0.0, %v338_v27 }
 0x496   :  { %v344_v12 = vpop.permute.xlu1 %343 }
 0x497   :  { %v346_v29 = vmul.f32 %v344_v12, %v338_v27 }
 0x499   :  { %348 = vrot.lane.b32.xlu2 %v346_v29, %s2243_s3 }
 0x4f3   :  { %v349_v31 = vpop.permute.xlu2 %348 }
 0x4f4   :  { %v2416_v32 = vadd.f32 %v349_v31, %v341_v30 }
 0x4f6   :  { %1980 = vtanh.f32 %v2416_v32  ;;  %404 = vrot.lane.b32.xlu1 %v2416_v32, %s2244_s11 }
 0x4fc   :  { %v1981_v33 = vpop.eup %1980 }
 0x4fd   :  { %354 = vrot.lane.b32.xlu0 %v1981_v33, %s2242_s2 }
 0x568   :  { %v405_v34 = vpop.permute.xlu1 %404 }
 0x569   :  { %1898 = vmatmul.msk.f32.vlgmr.msrb.gmra.mxu3 %vm103_vm0, %v405_v34 }
 0x56a   :  { %1037 = vmatpush.msrb.mxu3 %v2366_v9 }
 0x56c   :  { %1038 = vmatpush.msrb.mxu3 %v2368_v15 }
 0x56e   :  { %1039 = vmatpush.msrb.mxu3 %v2372_v16 }
 0x56f   :  { %v355_v35 = vpop.permute.xlu0 %354 }
 0x570   :  { %v357_v38 = vmul.f32 %v355_v35, %v338_v27  ;;  %1040 = vmatpush.msrb.mxu3 %v2377_v17 }
 0x572   :  { %359 = vrot.lane.b32.xlu0 %v357_v38, %s2243_s3 }
 0x5e4   :  { %v360_v39 = vpop.permute.xlu0 %359 }
 0x5e5   :  { %1896 = vmatmul.msk.f32.vlgmr.msrb.gmra.mxu1 %vm103_vm0, %v360_v39  ;;  %1897 = vmatmul.msk.f32.vlgmr.msrb.gmra.mxu2 %vm103_vm0, %v360_v39 }
 0x5e6   :  { %848 = vmatpush.msrb.mxu1 %v2289_v0  ;;  %1017 = vmatpush.msrb.mxu2 %v2296_v6 }
 0x5e8   :  { %849 = vmatpush.msrb.mxu1 %v2291_v2  ;;  %1018 = vmatpush.msrb.mxu2 %v2299_v7 }
 0x5ea   :  { %850 = vmatpush.msrb.mxu1 %v2294_v4  ;;  %1019 = vmatpush.msrb.mxu2 %v2308_v11 }
 0x5ec   :  { %851 = vmatpush.msrb.mxu1 %v2302_v8  ;;  %1020 = vmatpush.msrb.mxu2 %v2314_v13  ;;  %v425_v40 = vpop.f32.mrf.mxu3 }
 0x662   :  { %v380_v41 = vpop.f32.mrf.mxu1 }
 0x663   :  { %v428_v42 = vadd.f32 %v425_v40, %v380_v41 }
 0x665   :  { %v430_v44 = vrot.slane %v428_v42, 1  ;;  %v431_v45 = vperm.slane %v428_v42, 0 }
 0x667   :  { %v432_v46 = vperm.slane %v430_v44, 0  ;;  %v435_v47 = vadd.f32 %v431_v45, %v2339_v19 }
 0x669   :  { %v436_v48 = vadd.f32 %v432_v46, %v2341_v24  ;;  %1982 = vtanh.f32 %v435_v47 }
 0x66b   :  { %1984 = vtanh.f32 %v436_v48 }
 0x66f   :  { %v1983_v49 = vpop.eup %1982 }
 0x670   :  { %v439_v51 = vmul.f32 %v1983_v49, %v2345_v28 }
 0x671   :  { %v1985_v52 = vpop.eup %1984 }
 0x672   :  { %v441_v54 = vsel %vm103_vm0, %v439_v51, 0.0  ;;  %v440_v55 = vmul.f32 %v1985_v52, %v2345_v28 }
 0x673   :  { %442 = vadd.xlane.f32.xlu1 %v441_v54 }
 0x674   :  { %v444_v56 = vsel %vm103_vm0, %v440_v55, 0.0 }
 0x675   :  { %445 = vadd.xlane.f32.xlu0 %v444_v56 }
 0x6e6   :  { %v443_v58 = vpop.xlane.xlu1 %442 }
 0x6e7   :  { %v449_v60 = vperm.slane %v443_v58, %v2351_v37 }
 0x6e8   :  { %v446_v59 = vpop.xlane.xlu0 %445 }
 0x6e9   :  { %v450_v61 = vperm.slane %v446_v59, %v2351_v37 }
 0x6eb   :  { %v451_v62 = vsel %vm234_vm1, %v450_v61, %v449_v60 }
 0x6ec   :  { %v453_v63 = vsel %vm237_vm2, %v451_v62, -inf }
 0x6ed   :  { %454 = vmax.xlane.f32.xlu2 %v453_v63 }
 0x760   :  { %v455_v1 = vpop.xlane.xlu2 %454 }
 0x761   :  { %v457_v3 = vperm.slane %v455_v1, 0  ;;  %v458_v18 = vperm.slane %v455_v1, 1 }
 0x763   :  { %v461_v20 = vsub.f32 %v443_v58, %v457_v3  ;;  %v462_v21 = vsub.f32 %v446_v59, %v458_v18 }
 0x765   :  { %v463_v22 = vmul.f32 1.442695, %v461_v20  ;;  %v465_v23 = vmul.f32 1.442695, %v462_v21 }
 0x767   :  { %1986 = vpow2.f32 %v463_v22 }
 0x768   :  { %1988 = vpow2.f32 %v465_v23 }
 0x76d   :  { %v1987_v25 = vpop.eup %1986 }
 0x76e   :  { %v1989_v26 = vpop.eup %1988  ;;  %470 = vperm.xlu1 %1949, %v1987_v25  }
 0x76f   :  { %473 = vperm.xlu0 %1947, %v1989_v26  }
 0x7e0   :  { %v471_v12 = vpop.permute.xlu1 %470 }
 0x7e1   :  { %v474_v27 = vpop.permute.xlu0 %473  ;;  %v475_v29 = vperm.slane %v471_v12, %v2351_v37 }
 0x7e2   :  { %v476_v30 = vperm.slane %v474_v27, %v2351_v37 }
 0x7e4   :  { %v477_v31 = vsel %vm234_vm1, %v476_v30, %v475_v29 }
 0x7e5   :  { %v479_v33 = vsel %vm237_vm2, %v477_v31, 0.0 }
 0x7e6   :  { %480 = vadd.xlane.f32.xlu2 %v479_v33 }
 0x859   :  { %v481_v34 = vpop.xlane.xlu2 %480 }
 0x85a   :  { %1990 = vrcp.f32 %v481_v34 }
 0x860   :  { %v1991_v35 = vpop.eup %1990 }
 0x861   :  { %v485_v38 = vperm.slane %v1991_v35, 1  ;;  %v484_v39 = vperm.slane %v1991_v35, 0 }
 0x863   :  { %v489_v40 = vmul.f32 %v1989_v26, %v485_v38  ;;  %v488_v41 = vmul.f32 %v1987_v25, %v484_v39  ;;  %v400_v26 = vpop.f32.mrf.mxu2 }
 0x865   :  { %497 = vperm.xlu2 %1946, %v489_v40   ;;  %492 = vperm.xlu1 %1949, %v488_v41  }
 0x86d   :  { %1950 = vset.pattern.permute.xlu1 %v2241_v5 }
 0x8bf   :  { %v498_v42 = vpop.permute.xlu2 %497 }
 0x8c0   :  { %v501_v44 = vmul.f32 %v498_v42, %v2323_v14 }
 0x8c2   :  { %v509_v45 = vsel %vm103_vm0, %v501_v44, 0.0 }
 0x8c3   :  { %v510_v46 = vrot.slane %v509_v45, 4 }
 0x8c5   :  { %v511_v47 = vadd.f32 %v510_v46, %v509_v45 }
 0x8c7   :  { %v512_v48 = vrot.slane %v511_v47, 2 }
 0x8c9   :  { %v513_v49 = vadd.f32 %v512_v48, %v511_v47 }
 0x8cb   :  { %v514_v55 = vrot.slane %v513_v49, 1 }
 0x8cd   :  { %v515_v59 = vadd.f32 %v514_v55, %v513_v49 }
 0x8cf   :  { %v517_v62 = vmul.f32 %v515_v59, %v2399_v36 }
 0x8d1   :  { %v520_v3 = vrot.slane %v517_v62, 7 }
 0x8d7   :  { %v493_v51 = vpop.permute.xlu1 %492 }
 0x8d8   :  { %v500_v52 = vmul.f32 %v493_v51, %v2305_v10 }
 0x8da   :  { %v502_v54 = vsel %vm103_vm0, %v500_v52, 0.0 }
 0x8db   :  { %v503_v56 = vrot.slane %v502_v54, 4 }
 0x8dd   :  { %v504_v58 = vadd.f32 %v503_v56, %v502_v54 }
 0x8df   :  { %v505_v60 = vrot.slane %v504_v58, 2 }
 0x8e1   :  { %v506_v5 = vadd.f32 %v505_v60, %v504_v58 }
 0x8e3   :  { %v507_v61 = vrot.slane %v506_v5, 1 }
 0x8e5   :  { %v508_v63 = vadd.f32 %v507_v61, %v506_v5 }
 0x8e7   :  { %v516_v1 = vmul.f32 %v508_v63, %v2399_v36 }
 0x8e9   :  { %v521_v18 = vsel %vm234_vm1, %v520_v3, %v516_v1 }
 0x8ea   :  { %v523_v20 = vsel %vm308_vm3, %v521_v18, 0.0 }
 0x8eb   :  { %524 = vadd.xlane.f32.xlu0 %v523_v20 }
 0x95e   :  { %v525_v21 = vpop.xlane.xlu0 %524 }
 0x95f   :  { %v526_v22 = vadd.f32 %v525_v21, %v2405_v50 }
 0x961   :  { %529 = vperm.xlu1 %1950, %v526_v22  }
 0x969   :  { %1952 = vset.pattern.permute.xlu1 %v2240_v43 }
 0x9d3   :  { %v530_v23 = vpop.permute.xlu1 %529 }
 0x9d4   :  { %v532_v25 = vmul.f32 %v530_v23, %v2408_v53 }
 0x9d6   :  { %v533_v12 = vadd.f32 %v532_v25, %v400_v26 }
 0x9d8   :  { %v534_v27 = vadd.f32 %v533_v12, %v2411_v57 }
 0x9da   :  { %1992 = vtanh.f32 %v534_v27  ;;  %v1899_v30 = vmul.f32 -1.442695, %v534_v27 }
 0x9dc   :  { %1994 = vpow2.f32 %v1899_v30 }
 0x9e0   :  { %v1993_v29 = vpop.eup %1992 }
 0x9e1   :  { %557 = vrot.lane.b32.xlu2 %v1993_v29, %s2242_s2 }
 0x9e2   :  { %v1995_v31 = vpop.eup %1994 }
 0x9e3   :  { %v538_v33 = vadd.f32 1.0, %v1995_v31 }
 0x9e5   :  { %1996 = vrcp.f32 %v538_v33  ;;  %v550_v41 = vand.u32 2147483648, %v538_v33  ;;  %vm544_vm9 = vweird.f32 %v538_v33  ;;  %v548_v42 = vand.u32 2147483647, %v538_v33 }
 0x9e7   :  { %v551_v45 = vor.u32 1.1754944e-38, %v550_v41  ;;  %vm549_vm11 = vcmp.eq.f32.partialorder %v548_v42, 8.507059e+37 }
 0x9eb   :  { %v1997_v34 = vpop.eup %1996 }
 0x9ec   :  { %v540_v35 = vmul.f32 %v1997_v34, %v538_v33  ;;  %vm545_vm8 = vweird.f32 %v1997_v34 }
 0x9ed   :  { %vm546_vm10 = vmor %vm544_vm9, %vm545_vm8 }
 0x9ee   :  { %v541_v38 = vsub.f32 1.0, %v540_v35 }
 0x9f0   :  { %v542_v39 = vmul.f32 %v1997_v34, %v541_v38 }
 0x9f2   :  { %v543_v40 = vadd.f32 %v1997_v34, %v542_v39 }
 0x9f4   :  { %v547_v44 = vsel %vm546_vm10, %v1997_v34, %v543_v40 }
 0x9f5   :  { %v552_v47 = vsel %vm549_vm11, %v551_v45, %v547_v44 }
 0x9f6   :  { %v555_v49 = vmul.f32 %v552_v47, %v2416_v32 }
 0xa3b   :  { %v558_v46 = vpop.permute.xlu2 %557 }
 0xa3c   :  { %v560_v48 = vmul.f32 %v558_v46, %v552_v47 }
 0xa3e   :  { %562 = vrot.lane.b32.xlu1 %v560_v48, %s2243_s3 }
 0xab0   :  { %v563_v51 = vpop.permute.xlu1 %562 }
 0xab1   :  { %v2468_v52 = vadd.f32 %v563_v51, %v555_v49 }
 0xab3   :  { %1998 = vtanh.f32 %v2468_v52  ;;  %618 = vrot.lane.b32.xlu1 %v2468_v52, %s2244_s11 }
 0xab9   :  { %v1999_v54 = vpop.eup %1998 }
 0xaba   :  { %568 = vrot.lane.b32.xlu2 %v1999_v54, %s2242_s2 }
 0xb14   :  { %v569_v55 = vpop.permute.xlu2 %568 }
 0xb15   :  { %v571_v56 = vmul.f32 %v569_v55, %v552_v47 }
 0xb17   :  { %573 = vrot.lane.b32.xlu2 %v571_v56, %s2243_s3 }
 0xb25   :  { %v619_v58 = vpop.permute.xlu1 %618 }
 0xb26   :  { %1902 = vmatmul.msk.f32.vlgmr.msra.gmra.mxu2 %vm103_vm0, %v619_v58 }
 0xb27   :  { %1251 = vmatpush.msra.mxu2 %v2366_v9 }
 0xb29   :  { %1252 = vmatpush.msra.mxu2 %v2368_v15 }
 0xb2b   :  { %1253 = vmatpush.msra.mxu2 %v2372_v16 }
 0xb2d   :  { %1254 = vmatpush.msra.mxu2 %v2377_v17 }
 0xb71   :  { %v574_v32 = vpop.permute.xlu2 %573 }
 0xb72   :  { %1900 = vmatmul.msk.f32.vlgmr.msrb.gmra.mxu0 %vm103_vm0, %v574_v32  ;;  %1901 = vmatmul.msk.f32.vlgmr.msra.gmra.mxu1 %vm103_vm0, %v574_v32 }
 0xb73   :  { %1062 = vmatpush.msrb.mxu0 %v2289_v0  ;;  %1231 = vmatpush.msra.mxu1 %v2296_v6 }
 0xb75   :  { %1063 = vmatpush.msrb.mxu0 %v2291_v2  ;;  %1232 = vmatpush.msra.mxu1 %v2299_v7 }
 0xb77   :  { %1064 = vmatpush.msrb.mxu0 %v2294_v4  ;;  %1233 = vmatpush.msra.mxu1 %v2308_v11 }
 0xb79   :  { %1065 = vmatpush.msrb.mxu0 %v2302_v8  ;;  %1234 = vmatpush.msra.mxu1 %v2314_v13 }
 0xba9   :  { %v639_v59 = vpop.f32.mrf.mxu2 }
 0xbef   :  { %v594_v60 = vpop.f32.mrf.mxu0 }
 0xbf0   :  { %v642_v5 = vadd.f32 %v639_v59, %v594_v60 }
 0xbf2   :  { %v644_v61 = vrot.slane %v642_v5, 1  ;;  %v645_v62 = vperm.slane %v642_v5, 0 }
 0xbf4   :  { %v646_v0 = vperm.slane %v644_v61, 0  ;;  %v649_v63 = vadd.f32 %v645_v62, %v2339_v19 }
 0xbf6   :  { %v650_v2 = vadd.f32 %v646_v0, %v2341_v24  ;;  %2000 = vtanh.f32 %v649_v63 }
 0xbf8   :  { %2002 = vtanh.f32 %v650_v2 }
 0xbfc   :  { %v2001_v1 = vpop.eup %2000 }
 0xbfd   :  { %v653_v4 = vmul.f32 %v2001_v1, %v2345_v28 }
 0xbfe   :  { %v2003_v3 = vpop.eup %2002 }
 0xbff   :  { %v655_v18 = vsel %vm103_vm0, %v653_v4, 0.0  ;;  %v654_v20 = vmul.f32 %v2003_v3, %v2345_v28 }
 0xc00   :  { %656 = vadd.xlane.f32.xlu1 %v655_v18 }
 0xc01   :  { %v658_v21 = vsel %vm103_vm0, %v654_v20, 0.0 }
 0xc02   :  { %659 = vadd.xlane.f32.xlu2 %v658_v21 }
 0xc73   :  { %v657_v22 = vpop.xlane.xlu1 %656 }
 0xc74   :  { %v663_v25 = vperm.slane %v657_v22, %v2351_v37 }
 0xc75   :  { %v660_v23 = vpop.xlane.xlu2 %659 }
 0xc76   :  { %v664_v26 = vperm.slane %v660_v23, %v2351_v37 }
 0xc78   :  { %v665_v12 = vsel %vm234_vm1, %v664_v26, %v663_v25 }
 0xc79   :  { %v667_v27 = vsel %vm237_vm2, %v665_v12, -inf }
 0xc7a   :  { %668 = vmax.xlane.f32.xlu0 %v667_v27 }
 0xced   :  { %v669_v29 = vpop.xlane.xlu0 %668 }
 0xcee   :  { %v671_v30 = vperm.slane %v669_v29, 0  ;;  %v672_v31 = vperm.slane %v669_v29, 1 }
 0xcf0   :  { %v675_v33 = vsub.f32 %v657_v22, %v671_v30  ;;  %v676_v35 = vsub.f32 %v660_v23, %v672_v31 }
 0xcf2   :  { %v677_v34 = vmul.f32 1.442695, %v675_v33  ;;  %v679_v38 = vmul.f32 1.442695, %v676_v35 }
 0xcf4   :  { %2004 = vpow2.f32 %v677_v34  ;;  %v614_v34 = vpop.f32.mrf.mxu1 }
 0xcf5   :  { %2006 = vpow2.f32 %v679_v38 }
 0xcfa   :  { %v2005_v39 = vpop.eup %2004 }
 0xcfb   :  { %684 = vperm.xlu0 %1947, %v2005_v39   ;;  %v2007_v40 = vpop.eup %2006 }
 0xd03   :  { %687 = vperm.xlu0 %1947, %v2007_v40  }
 0xd6d   :  { %v685_v41 = vpop.permute.xlu0 %684 }
 0xd6e   :  { %v689_v44 = vperm.slane %v685_v41, %v2351_v37 }
 0xd75   :  { %v688_v42 = vpop.permute.xlu0 %687 }
 0xd76   :  { %v690_v45 = vperm.slane %v688_v42, %v2351_v37 }
 0xd78   :  { %v691_v46 = vsel %vm234_vm1, %v690_v45, %v689_v44 }
 0xd79   :  { %v693_v47 = vsel %vm237_vm2, %v691_v46, 0.0 }
 0xd7a   :  { %694 = vadd.xlane.f32.xlu1 %v693_v47 }
 0xded   :  { %v695_v48 = vpop.xlane.xlu1 %694 }
 0xdee   :  { %2008 = vrcp.f32 %v695_v48 }
 0xdf4   :  { %v2009_v49 = vpop.eup %2008 }
 0xdf5   :  { %v699_v51 = vperm.slane %v2009_v49, 1  ;;  %v698_v54 = vperm.slane %v2009_v49, 0 }
 0xdf7   :  { %v703_v55 = vmul.f32 %v2007_v40, %v699_v51  ;;  %v702_v56 = vmul.f32 %v2005_v39, %v698_v54 }
 0xdf9   :  { %711 = vperm.xlu2 %1946, %v703_v55   ;;  %706 = vperm.xlu0 %1947, %v702_v56  }
 0xe53   :  { %v712_v58 = vpop.permute.xlu2 %711 }
 0xe54   :  { %v715_v32 = vmul.f32 %v712_v58, %v2323_v14 }
 0xe56   :  { %v723_v59 = vsel %vm103_vm0, %v715_v32, 0.0 }
 0xe57   :  { %v724_v60 = vrot.slane %v723_v59, 4 }
 0xe59   :  { %v725_v5 = vadd.f32 %v724_v60, %v723_v59 }
 0xe5b   :  { %v726_v61 = vrot.slane %v725_v5, 2 }
 0xe5d   :  { %v727_v62 = vadd.f32 %v726_v61, %v725_v5 }
 0xe5f   :  { %v728_v1 = vrot.slane %v727_v62, 1 }
 0xe61   :  { %v729_v18 = vadd.f32 %v728_v1, %v727_v62  ;;  %v2537_v1 = vld [vmem:[#allocation6 + $0x60] sm:$0xff] }
 0xe63   :  { %v731_v14 = vmul.f32 %v729_v18, %v2399_v36 }
 0xe65   :  { %v734_v26 = vrot.slane %v731_v14, 7 }
 0xe6b   :  { %v707_v0 = vpop.permute.xlu0 %706 }
 0xe6c   :  { %v714_v63 = vmul.f32 %v707_v0, %v2305_v10  ;;  %v2245_v10 = vmov 2  }
 0xe6d   :  { %1951 = vset.pattern.permute.xlu0 %v2245_v10 }
 0xe6e   :  { %v716_v2 = vsel %vm103_vm0, %v714_v63, 0.0 }
 0xe6f   :  { %v717_v4 = vrot.slane %v716_v2, 4 }
 0xe71   :  { %v718_v3 = vadd.f32 %v717_v4, %v716_v2  ;;  %v2533_v2 = vld [vmem:[#allocation6 + $0x70] sm:$0xff] }
 0xe73   :  { %v719_v20 = vrot.slane %v718_v3, 2 }
 0xe75   :  { %v720_v21 = vadd.f32 %v719_v20, %v718_v3 }
 0xe77   :  { %v721_v22 = vrot.slane %v720_v21, 1 }
 0xe79   :  { %v722_v23 = vadd.f32 %v721_v22, %v720_v21 }
 0xe7b   :  { %v730_v25 = vmul.f32 %v722_v23, %v2399_v36 }
 0xe7d   :  { %v735_v12 = vsel %vm234_vm1, %v734_v26, %v730_v25 }
 0xe7e   :  { %v737_v27 = vsel %vm308_vm3, %v735_v12, 0.0 }
 0xe7f   :  { %738 = vadd.xlane.f32.xlu1 %v737_v27 }
 0xef2   :  { %v739_v29 = vpop.xlane.xlu1 %738 }
 0xef3   :  { %v740_v30 = vadd.f32 %v739_v29, %v2405_v50 }
 0xef5   :  { %743 = vperm.xlu0 %1951, %v740_v30  }
 0xefd   :  { %1953 = vset.pattern.permute.xlu0 %v2240_v43 }
 0xf67   :  { %v744_v31 = vpop.permute.xlu0 %743 }
 0xf68   :  { %v746_v33 = vmul.f32 %v744_v31, %v2408_v53 }
 0xf6a   :  { %v747_v35 = vadd.f32 %v746_v33, %v614_v34 }
 0xf6c   :  { %v748_v38 = vadd.f32 %v747_v35, %v2411_v57 }
 0xf6e   :  { %2010 = vtanh.f32 %v748_v38  ;;  %v1903_v40 = vmul.f32 -1.442695, %v748_v38 }
 0xf70   :  { %2012 = vpow2.f32 %v1903_v40 }
 0xf74   :  { %v2011_v39 = vpop.eup %2010 }
 0xf75   :  { %771 = vrot.lane.b32.xlu1 %v2011_v39, %s2242_s2 }
 0xf76   :  { %v2013_v41 = vpop.eup %2012 }
 0xf77   :  { %v752_v42 = vadd.f32 1.0, %v2013_v41 }
 0xf79   :  { %2014 = vrcp.f32 %v752_v42  ;;  %v764_v49 = vand.u32 2147483648, %v752_v42  ;;  %vm758_vm13 = vweird.f32 %v752_v42  ;;  %v762_v51 = vand.u32 2147483647, %v752_v42 }
 0xf7b   :  { %v765_v55 = vor.u32 1.1754944e-38, %v764_v49  ;;  %vm763_vm15 = vcmp.eq.f32.partialorder %v762_v51, 8.507059e+37 }
 0xf7f   :  { %v2015_v44 = vpop.eup %2014 }
 0xf80   :  { %v754_v45 = vmul.f32 %v2015_v44, %v752_v42  ;;  %vm759_vm12 = vweird.f32 %v2015_v44 }
 0xf81   :  { %vm760_vm14 = vmor %vm758_vm13, %vm759_vm12 }
 0xf82   :  { %v755_v46 = vsub.f32 1.0, %v754_v45 }
 0xf84   :  { %v756_v47 = vmul.f32 %v2015_v44, %v755_v46 }
 0xf86   :  { %v757_v48 = vadd.f32 %v2015_v44, %v756_v47 }
 0xf88   :  { %v761_v54 = vsel %vm760_vm14, %v2015_v44, %v757_v48 }
 0xf89   :  { %v766_v58 = vsel %vm763_vm15, %v765_v55, %v761_v54 }
 0xf8a   :  { %v769_v59 = vmul.f32 %v766_v58, %v2468_v52 }
 0xfe7   :  { %v772_v56 = vpop.permute.xlu1 %771 }
 0xfe8   :  { %v774_v32 = vmul.f32 %v772_v56, %v766_v58 }
 0xfea   :  { %776 = vrot.lane.b32.xlu2 %v774_v32, %s2243_s3 }
0x1044   :  { %v777_v60 = vpop.permute.xlu2 %776 }
0x1045   :  { %v2519_v5 = vadd.f32 %v777_v60, %v769_v59  ;;  %v2564_v59 = vld [vmem:[#allocation2] sm:$0xff] }
0x1047   :  { %2016 = vtanh.f32 %v2519_v5 }
0x104d   :  { %v2017_v61 = vpop.eup %2016 }
0x104e   :  { %782 = vrot.lane.b32.xlu0 %v2017_v61, %s2242_s2 }
0x1056   :  { %832 = vrot.lane.b32.xlu0 %v2519_v5, %s2244_s11 }
0x10c0   :  { %v783_v62 = vpop.permute.xlu0 %782 }
0x10c1   :  { %v785_v0 = vmul.f32 %v783_v62, %v766_v58  ;;  %v2561_v58 = vld [vmem:[#allocation2 + $0x8] sm:$0xff] }
0x10c3   :  { %787 = vrot.lane.b32.xlu2 %v785_v0, %s2243_s3 }
0x10c8   :  { %v833_v63 = vpop.permute.xlu0 %832 }
0x10c9   :  { %1906 = vmatmul.msk.f32.vlgmr.msrb.gmra.mxu1 %vm103_vm0, %v833_v63 }
0x10ca   :  { %1465 = vmatpush.msrb.mxu1 %v2366_v9  ;;  %v2541_v9 = vld [vmem:[#allocation6 + $0x50] sm:$0xff] }
0x10cc   :  { %1466 = vmatpush.msrb.mxu1 %v2368_v15 }
0x10ce   :  { %1467 = vmatpush.msrb.mxu1 %v2372_v16 }
0x10d0   :  { %1468 = vmatpush.msrb.mxu1 %v2377_v17 }
0x111d   :  { %v788_v52 = vpop.permute.xlu2 %787 }
0x111e   :  { %1904 = vmatmul.msk.f32.vlgmr.msra.gmra.mxu3 %vm103_vm0, %v788_v52  ;;  %1905 = vmatmul.msk.f32.vlgmr.msra.gmra.mxu0 %vm103_vm0, %v788_v52 }
0x111f   :  { %1276 = vmatpush.msra.mxu3 %v2533_v2  ;;  %1445 = vmatpush.msra.mxu0 %v2296_v6 }
0x1121   :  { %1277 = vmatpush.msra.mxu3 %v2537_v1  ;;  %1446 = vmatpush.msra.mxu0 %v2299_v7 }
0x1123   :  { %1278 = vmatpush.msra.mxu3 %v2541_v9  ;;  %1447 = vmatpush.msra.mxu0 %v2308_v11 }
0x1125   :  { %1279 = vmatpush.msra.mxu3 %v2302_v8  ;;  %1448 = vmatpush.msra.mxu0 %v2314_v13 }
0x1146   :  { %v853_v15 = vpop.f32.mrf.mxu1 }
0x11a1   :  { %v808_v16 = vpop.f32.mrf.mxu3 }
0x11a2   :  { %v856_v17 = vadd.f32 %v853_v15, %v808_v16 }
0x11a4   :  { %v858_v6 = vrot.slane %v856_v17, 1  ;;  %v859_v4 = vperm.slane %v856_v17, 0 }
0x11a6   :  { %v860_v3 = vperm.slane %v858_v6, 0  ;;  %v863_v18 = vadd.f32 %v859_v4, %v2339_v19 }
0x11a8   :  { %v864_v7 = vadd.f32 %v860_v3, %v2341_v24  ;;  %2018 = vtanh.f32 %v863_v18 }
0x11aa   :  { %2020 = vtanh.f32 %v864_v7 }
0x11ae   :  { %v2019_v20 = vpop.eup %2018 }
0x11af   :  { %v867_v21 = vmul.f32 %v2019_v20, %v2345_v28 }
0x11b0   :  { %v2021_v11 = vpop.eup %2020 }
0x11b1   :  { %v869_v8 = vsel %vm103_vm0, %v867_v21, 0.0  ;;  %v868_v13 = vmul.f32 %v2021_v11, %v2345_v28 }
0x11b2   :  { %870 = vadd.xlane.f32.xlu1 %v869_v8 }
0x11b3   :  { %v872_v22 = vsel %vm103_vm0, %v868_v13, 0.0 }
0x11b4   :  { %873 = vadd.xlane.f32.xlu2 %v872_v22 }
0x1225   :  { %v871_v14 = vpop.xlane.xlu1 %870 }
0x1226   :  { %v877_v25 = vperm.slane %v871_v14, %v2351_v37 }
0x1227   :  { %v874_v23 = vpop.xlane.xlu2 %873 }
0x1228   :  { %v878_v26 = vperm.slane %v874_v23, %v2351_v37 }
0x122a   :  { %v879_v12 = vsel %vm234_vm1, %v878_v26, %v877_v25 }
0x122b   :  { %v881_v27 = vsel %vm237_vm2, %v879_v12, -inf }
0x122c   :  { %882 = vmax.xlane.f32.xlu0 %v881_v27  ;;  %v828_v27 = vpop.f32.mrf.mxu0 }
0x129f   :  { %v883_v10 = vpop.xlane.xlu0 %882 }
0x12a0   :  { %v885_v29 = vperm.slane %v883_v10, 0  ;;  %v886_v30 = vperm.slane %v883_v10, 1 }
0x12a2   :  { %v889_v31 = vsub.f32 %v871_v14, %v885_v29  ;;  %v890_v28 = vsub.f32 %v874_v23, %v886_v30  ;;  %v2246_v14 = vmov 3  }
0x12a4   :  { %v891_v33 = vmul.f32 1.442695, %v889_v31  ;;  %v893_v34 = vmul.f32 1.442695, %v890_v28 }
0x12a6   :  { %2022 = vpow2.f32 %v891_v33 }
0x12a7   :  { %2024 = vpow2.f32 %v893_v34 }
0x12ac   :  { %v2023_v35 = vpop.eup %2022 }
0x12ad   :  { %v2025_v38 = vpop.eup %2024  ;;  %898 = vperm.xlu1 %1952, %v2023_v35  }
0x12ae   :  { %901 = vperm.xlu2 %1946, %v2025_v38  }
0x1308   :  { %v902_v39 = vpop.permute.xlu2 %901 }
0x1309   :  { %v904_v41 = vperm.slane %v902_v39, %v2351_v37 }
0x131f   :  { %v899_v40 = vpop.permute.xlu1 %898 }
0x1320   :  { %v903_v42 = vperm.slane %v899_v40, %v2351_v37 }
0x1322   :  { %v905_v44 = vsel %vm234_vm1, %v904_v41, %v903_v42 }
0x1323   :  { %v907_v45 = vsel %vm237_vm2, %v905_v44, 0.0 }
0x1324   :  { %908 = vadd.xlane.f32.xlu0 %v907_v45 }
0x1397   :  { %v909_v46 = vpop.xlane.xlu0 %908 }
0x1398   :  { %2026 = vrcp.f32 %v909_v46 }
0x139e   :  { %v2027_v47 = vpop.eup %2026 }
0x139f   :  { %v913_v48 = vperm.slane %v2027_v47, 1  ;;  %v912_v49 = vperm.slane %v2027_v47, 0 }
0x13a1   :  { %v917_v51 = vmul.f32 %v2025_v38, %v913_v48  ;;  %v916_v54 = vmul.f32 %v2023_v35, %v912_v49 }
0x13a3   :  { %925 = vperm.xlu0 %1953, %v917_v51   ;;  %920 = vperm.xlu1 %1952, %v916_v54  }
0x13ab   :  { %1954 = vset.pattern.permute.xlu1 %v2246_v14 }
0x1415   :  { %v926_v55 = vpop.permute.xlu0 %925  ;;  %v921_v56 = vpop.permute.xlu1 %920 }
0x1416   :  { %v929_v32 = vmul.f32 %v2561_v58, %v926_v55  ;;  %v928_v60 = vmul.f32 %v2564_v59, %v921_v56  ;;  %v2113_v56 = vld [vmem:[#allocation6 + $0x38] sm:$0xff] }
0x1418   :  { %v937_v61 = vsel %vm103_vm0, %v929_v32, 0.0  ;;  %v930_v62 = vsel %vm103_vm0, %v928_v60, 0.0  ;;  %v2115_v32 = vld [vmem:[#allocation6 + $0x18] sm:$0xff]  ;;  %v2116_v60 = vld [vmem:[#allocation6 + $0x8] sm:$0xff] }
0x1419   :  { %v938_v0 = vrot.slane %v937_v61, 4  ;;  %v931_v63 = vrot.slane %v930_v62, 4 }
0x141b   :  { %v939_v52 = vadd.f32 %v938_v0, %v937_v61  ;;  %v932_v15 = vadd.f32 %v931_v63, %v930_v62  ;;  %v2117_v62 = vld [vmem:[#allocation6 + $0x30] sm:$0xff]  ;;  %v2118_v0 = vld [vmem:[#allocation6 + $0x20] sm:$0xff] }
0x141c   :  { %v2119_v63 = vld [vmem:[#allocation6 + $0x10] sm:$0xff] }
0x141d   :  { %v940_v16 = vrot.slane %v939_v52, 2  ;;  %v933_v17 = vrot.slane %v932_v15, 2 }
0x141f   :  { %v941_v6 = vadd.f32 %v940_v16, %v939_v52  ;;  %v934_v4 = vadd.f32 %v933_v17, %v932_v15  ;;  %v2593_v52 = vld [vmem:[#allocation6 + $0x40] sm:$0xff] }
0x1420   :  { %v2121_v15 = vld [vmem:[#allocation6] sm:$0xff] }
0x1421   :  { %v942_v3 = vrot.slane %v941_v6, 1  ;;  %v935_v18 = vrot.slane %v934_v4, 1 }
0x1423   :  { %v943_v7 = vadd.f32 %v942_v3, %v941_v6  ;;  %v936_v20 = vadd.f32 %v935_v18, %v934_v4 }
0x1425   :  { %v945_v21 = vmul.f32 %v943_v7, %v2399_v36  ;;  %v944_v11 = vmul.f32 %v936_v20, %v2399_v36 }
0x1427   :  { %v948_v8 = vrot.slane %v945_v21, 7 }
0x1429   :  { %v949_v13 = vsel %vm234_vm1, %v948_v8, %v944_v11  ;;  %v2598_v11 = vld [vmem:[#allocation7 + $0x1] ss:$0 sm:$0xff] }
0x142a   :  { %v951_v22 = vsel %vm308_vm3, %v949_v13, 0.0 }
0x142b   :  { %952 = vadd.xlane.f32.xlu2 %v951_v22 }
0x149e   :  { %v953_v23 = vpop.xlane.xlu2 %952 }
0x149f   :  { %v954_v25 = vadd.f32 %v953_v23, %v2405_v50 }
0x14a1   :  { %957 = vperm.xlu1 %1954, %v954_v25  }
0x14a9   :  { %1957 = vset.pattern.permute.xlu1 %v2240_v43 }
0x1513   :  { %v958_v26 = vpop.permute.xlu1 %957 }
0x1514   :  { %v960_v12 = vmul.f32 %v958_v26, %v2408_v53 }
0x1516   :  { %v961_v10 = vadd.f32 %v960_v12, %v828_v27 }
0x1518   :  { %v962_v36 = vadd.f32 %v961_v10, %v2411_v57 }
0x151a   :  { %2028 = vtanh.f32 %v962_v36  ;;  %v1907_v30 = vmul.f32 -1.442695, %v962_v36 }
0x151c   :  { %2030 = vpow2.f32 %v1907_v30 }
0x1520   :  { %v2029_v29 = vpop.eup %2028 }
0x1521   :  { %985 = vrot.lane.b32.xlu1 %v2029_v29, %s2242_s2 }
0x1522   :  { %v2031_v31 = vpop.eup %2030 }
0x1523   :  { %v966_v28 = vadd.f32 1.0, %v2031_v31 }
0x1525   :  { %2032 = vrcp.f32 %v966_v28  ;;  %v978_v53 = vand.u32 2147483648, %v966_v28  ;;  %vm972_vm5 = vweird.f32 %v966_v28  ;;  %v976_v40 = vand.u32 2147483647, %v966_v28 }
0x1527   :  { %v979_v41 = vor.u32 1.1754944e-38, %v978_v53  ;;  %vm977_vm7 = vcmp.eq.f32.partialorder %v976_v40, 8.507059e+37 }
0x152b   :  { %v2033_v33 = vpop.eup %2032 }
0x152c   :  { %v968_v34 = vmul.f32 %v2033_v33, %v966_v28  ;;  %vm973_vm4 = vweird.f32 %v2033_v33 }
0x152d   :  { %vm974_vm6 = vmor %vm972_vm5, %vm973_vm4 }
0x152e   :  { %v969_v35 = vsub.f32 1.0, %v968_v34 }
0x1530   :  { %v970_v38 = vmul.f32 %v2033_v33, %v969_v35 }
0x1532   :  { %v971_v39 = vadd.f32 %v2033_v33, %v970_v38 }
0x1534   :  { %v975_v57 = vsel %vm974_vm6, %v2033_v33, %v971_v39 }
0x1535   :  { %v980_v44 = vsel %vm977_vm7, %v979_v41, %v975_v57 }
0x1536   :  { %v983_v46 = vmul.f32 %v980_v44, %v2519_v5  ;;  %v2114_v5 = vld [vmem:[#allocation6 + $0x28] sm:$0xff] }
0x1593   :  { %v986_v42 = vpop.permute.xlu1 %985 }
0x1594   :  { %v988_v45 = vmul.f32 %v986_v42, %v980_v44 }
0x1596   :  { %990 = vrot.lane.b32.xlu1 %v988_v45, %s2243_s3 }
0x1608   :  { %v991_v47 = vpop.permute.xlu1 %990 }
0x1609   :  { %v2580_v48 = vadd.f32 %v991_v47, %v983_v46 }
0x160b   :  { %2034 = vtanh.f32 %v2580_v48 }
0x1611   :  { %v2035_v49 = vpop.eup %2034 }
0x1612   :  { %996 = vrot.lane.b32.xlu0 %v2035_v49, %s2242_s2 }
0x161a   :  { %1046 = vrot.lane.b32.xlu0 %v2580_v48, %s2244_s11 }
0x1684   :  { %v997_v51 = vpop.permute.xlu0 %996 }
0x1685   :  { %v999_v54 = vmul.f32 %v997_v51, %v980_v44 }
0x1687   :  { %1001 = vrot.lane.b32.xlu1 %v999_v54, %s2243_s3 }
0x168c   :  { %v1047_v55 = vpop.permute.xlu0 %1046 }
0x168d   :  { %1910 = vmatmul.msk.f32.vlgmr.msrb.gmra.mxu0 %vm103_vm0, %v1047_v55 }
0x168e   :  { %1679 = vmatpush.msrb.mxu0 %v2113_v56 }
0x1690   :  { %1680 = vmatpush.msrb.mxu0 %v2114_v5 }
0x1692   :  { %1681 = vmatpush.msrb.mxu0 %v2115_v32 }
0x1694   :  { %1682 = vmatpush.msrb.mxu0 %v2116_v60 }
0x16f9   :  { %v1002_v61 = vpop.permute.xlu1 %1001 }
0x16fa   :  { %1908 = vmatmul.msk.f32.vlgmr.msrb.gmra.mxu2 %vm103_vm0, %v1002_v61  ;;  %1909 = vmatmul.msk.f32.vlgmr.msrb.gmra.mxu3 %vm103_vm0, %v1002_v61 }
0x16fb   :  { %1490 = vmatpush.msrb.mxu2 %v2533_v2  ;;  %1659 = vmatpush.msrb.mxu3 %v2117_v62 }
0x16fd   :  { %1491 = vmatpush.msrb.mxu2 %v2537_v1  ;;  %1660 = vmatpush.msrb.mxu3 %v2118_v0 }
0x16ff   :  { %1492 = vmatpush.msrb.mxu2 %v2541_v9  ;;  %1661 = vmatpush.msrb.mxu3 %v2119_v63 }
0x1701   :  { %1493 = vmatpush.msrb.mxu2 %v2593_v52  ;;  %1662 = vmatpush.msrb.mxu3 %v2121_v15 }
0x170a   :  { %v1067_v16 = vpop.f32.mrf.mxu0 }
0x177d   :  { %v1022_v17 = vpop.f32.mrf.mxu2 }
0x177e   :  { %v1070_v6 = vadd.f32 %v1067_v16, %v1022_v17 }
0x1780   :  { %v1072_v4 = vrot.slane %v1070_v6, 1  ;;  %v1073_v3 = vperm.slane %v1070_v6, 0 }
0x1782   :  { %v1074_v18 = vperm.slane %v1072_v4, 0  ;;  %v1077_v7 = vadd.f32 %v1073_v3, %v2339_v19 }
0x1784   :  { %v1078_v20 = vadd.f32 %v1074_v18, %v2341_v24  ;;  %2036 = vtanh.f32 %v1077_v7 }
0x1786   :  { %2038 = vtanh.f32 %v1078_v20  ;;  %v2616_v20 = vld [vmem:[#allocation7 + $0x4] ss:$0 sm:$0xff] }
0x178a   :  { %v2037_v21 = vpop.eup %2036 }
0x178b   :  { %v1081_v8 = vmul.f32 %v2598_v11, %v2037_v21 }
0x178c   :  { %v2039_v13 = vpop.eup %2038 }
0x178d   :  { %v1083_v22 = vsel %vm103_vm0, %v1081_v8, 0.0  ;;  %v1082_v14 = vmul.f32 %v2598_v11, %v2039_v13 }
0x178e   :  { %1084 = vadd.xlane.f32.xlu1 %v1083_v22 }
0x178f   :  { %v1086_v23 = vsel %vm103_vm0, %v1082_v14, 0.0 }
0x1790   :  { %1087 = vadd.xlane.f32.xlu2 %v1086_v23 }
0x1801   :  { %v1085_v25 = vpop.xlane.xlu1 %1084 }
0x1802   :  { %v1091_v12 = vperm.slane %v1085_v25, %v2351_v37 }
0x1803   :  { %v1088_v26 = vpop.xlane.xlu2 %1087 }
0x1804   :  { %v1092_v27 = vperm.slane %v1088_v26, %v2351_v37 }
0x1806   :  { %v1093_v10 = vsel %vm234_vm1, %v1092_v27, %v1091_v12 }
0x1807   :  { %v1095_v36 = vsel %vm237_vm2, %v1093_v10, -inf  ;;  %v2624_v10 = vld [vmem:[#allocation7 + $0x2] ss:$0 sm:$0xff] }
0x1808   :  { %1096 = vmax.xlane.f32.xlu0 %v1095_v36 }
0x187b   :  { %v1097_v29 = vpop.xlane.xlu0 %1096 }
0x187c   :  { %v1099_v30 = vperm.slane %v1097_v29, 0  ;;  %v1100_v31 = vperm.slane %v1097_v29, 1  ;;  %v1042_v29 = vpop.f32.mrf.mxu3 }
0x187e   :  { %v1103_v28 = vsub.f32 %v1085_v25, %v1099_v30  ;;  %v1104_v34 = vsub.f32 %v1088_v26, %v1100_v31  ;;  %v2247_v25 = vmov 4   ;;  %v2627_v31 = vld [vmem:[#allocation7 + $0x3] ss:$0 sm:$0xff] }
0x1880   :  { %v1105_v33 = vmul.f32 1.442695, %v1103_v28  ;;  %v1107_v35 = vmul.f32 1.442695, %v1104_v34 }
0x1882   :  { %2040 = vpow2.f32 %v1105_v33 }
0x1883   :  { %2042 = vpow2.f32 %v1107_v35 }
0x1888   :  { %v2041_v38 = vpop.eup %2040 }
0x1889   :  { %1112 = vperm.xlu2 %1946, %v2041_v38   ;;  %v2043_v39 = vpop.eup %2042 }
0x1891   :  { %1115 = vperm.xlu2 %1946, %v2043_v39  }
0x18e3   :  { %v1113_v53 = vpop.permute.xlu2 %1112 }
0x18e4   :  { %v1117_v57 = vperm.slane %v1113_v53, %v2351_v37 }
0x18eb   :  { %v1116_v40 = vpop.permute.xlu2 %1115 }
0x18ec   :  { %v1118_v41 = vperm.slane %v1116_v40, %v2351_v37 }
0x18ee   :  { %v1119_v42 = vsel %vm234_vm1, %v1118_v41, %v1117_v57 }
0x18ef   :  { %v1121_v44 = vsel %vm237_vm2, %v1119_v42, 0.0 }
0x18f0   :  { %1122 = vadd.xlane.f32.xlu1 %v1121_v44 }
0x1963   :  { %v1123_v45 = vpop.xlane.xlu1 %1122 }
0x1964   :  { %2044 = vrcp.f32 %v1123_v45 }
0x196a   :  { %v2045_v46 = vpop.eup %2044 }
0x196b   :  { %v1127_v47 = vperm.slane %v2045_v46, 1  ;;  %v1126_v49 = vperm.slane %v2045_v46, 0 }
0x196d   :  { %v1131_v51 = vmul.f32 %v2043_v39, %v1127_v47  ;;  %v1130_v54 = vmul.f32 %v2041_v38, %v1126_v49 }
0x196f   :  { %1139 = vperm.xlu2 %1946, %v1131_v51   ;;  %1134 = vperm.xlu0 %1953, %v1130_v54  }
0x1977   :  { %1955 = vset.pattern.permute.xlu2 %v2247_v25 }
0x19c9   :  { %v1140_v55 = vpop.permute.xlu2 %1139 }
0x19ca   :  { %v1143_v56 = vmul.f32 %v2561_v58, %v1140_v55 }
0x19cc   :  { %v1151_v5 = vsel %vm103_vm0, %v1143_v56, 0.0 }
0x19cd   :  { %v1152_v32 = vrot.slane %v1151_v5, 4 }
0x19cf   :  { %v1153_v60 = vadd.f32 %v1152_v32, %v1151_v5 }
0x19d1   :  { %v1154_v61 = vrot.slane %v1153_v60, 2 }
0x19d3   :  { %v1155_v62 = vadd.f32 %v1154_v61, %v1153_v60 }
0x19d5   :  { %v1156_v16 = vrot.slane %v1155_v62, 1 }
0x19d7   :  { %v1157_v4 = vadd.f32 %v1156_v16, %v1155_v62 }
0x19d9   :  { %v1159_v21 = vmul.f32 %v2616_v20, %v1157_v4 }
0x19db   :  { %v1162_v22 = vrot.slane %v1159_v21, 7 }
0x19e1   :  { %v1135_v0 = vpop.permute.xlu0 %1134 }
0x19e2   :  { %v1142_v63 = vmul.f32 %v2564_v59, %v1135_v0 }
0x19e4   :  { %v1144_v15 = vsel %vm103_vm0, %v1142_v63, 0.0 }
0x19e5   :  { %v1145_v17 = vrot.slane %v1144_v15, 4 }
0x19e7   :  { %v1146_v6 = vadd.f32 %v1145_v17, %v1144_v15 }
0x19e9   :  { %v1147_v3 = vrot.slane %v1146_v6, 2 }
0x19eb   :  { %v1148_v18 = vadd.f32 %v1147_v3, %v1146_v6 }
0x19ed   :  { %v1149_v7 = vrot.slane %v1148_v18, 1 }
0x19ef   :  { %v1150_v8 = vadd.f32 %v1149_v7, %v1148_v18 }
0x19f1   :  { %v1158_v13 = vmul.f32 %v2616_v20, %v1150_v8 }
0x19f3   :  { %v1163_v14 = vsel %vm234_vm1, %v1162_v22, %v1158_v13 }
0x19f4   :  { %v1165_v23 = vsel %vm308_vm3, %v1163_v14, 0.0 }
0x19f5   :  { %1166 = vadd.xlane.f32.xlu1 %v1165_v23 }
0x1a68   :  { %v1167_v26 = vpop.xlane.xlu1 %1166 }
0x1a69   :  { %v1168_v12 = vadd.f32 %v1167_v26, %v2405_v50 }
0x1a6b   :  { %1171 = vperm.xlu2 %1955, %v1168_v12  }
0x1a73   :  { %1956 = vset.pattern.permute.xlu2 %v2240_v43 }
0x1ac5   :  { %v1172_v27 = vpop.permute.xlu2 %1171 }
0x1ac6   :  { %v1174_v36 = vmul.f32 %v2624_v10, %v1172_v27 }
0x1ac8   :  { %v1175_v30 = vadd.f32 %v1174_v36, %v1042_v29 }
0x1aca   :  { %v1176_v28 = vadd.f32 %v2627_v31, %v1175_v30 }
0x1acc   :  { %2046 = vtanh.f32 %v1176_v28  ;;  %v1911_v34 = vmul.f32 -1.442695, %v1176_v28 }
0x1ace   :  { %2048 = vpow2.f32 %v1911_v34 }
0x1ad2   :  { %v2047_v33 = vpop.eup %2046 }
0x1ad3   :  { %1199 = vrot.lane.b32.xlu1 %v2047_v33, %s2242_s2 }
0x1ad4   :  { %v2049_v35 = vpop.eup %2048 }
0x1ad5   :  { %v1180_v38 = vadd.f32 1.0, %v2049_v35 }
0x1ad7   :  { %2050 = vrcp.f32 %v1180_v38  ;;  %v1192_v42 = vand.u32 2147483648, %v1180_v38  ;;  %vm1186_vm9 = vweird.f32 %v1180_v38  ;;  %v1190_v44 = vand.u32 2147483647, %v1180_v38 }
0x1ad9   :  { %v1193_v46 = vor.u32 1.1754944e-38, %v1192_v42  ;;  %vm1191_vm11 = vcmp.eq.f32.partialorder %v1190_v44, 8.507059e+37 }
0x1add   :  { %v2051_v39 = vpop.eup %2050 }
0x1ade   :  { %v1182_v53 = vmul.f32 %v2051_v39, %v1180_v38  ;;  %vm1187_vm8 = vweird.f32 %v2051_v39 }
0x1adf   :  { %vm1188_vm10 = vmor %vm1186_vm9, %vm1187_vm8  ;;  %vm1884_vm9 = vcmask 1024  }
0x1ae0   :  { %v1183_v40 = vsub.f32 1.0, %v1182_v53 }
0x1ae2   :  { %v1184_v57 = vmul.f32 %v2051_v39, %v1183_v40 }
0x1ae4   :  { %v1185_v41 = vadd.f32 %v2051_v39, %v1184_v57 }
0x1ae6   :  { %v1189_v45 = vsel %vm1188_vm10, %v2051_v39, %v1185_v41 }
0x1ae7   :  { %v1194_v49 = vsel %vm1191_vm11, %v1193_v46, %v1189_v45 }
0x1ae8   :  { %v1197_v54 = vmul.f32 %v1194_v49, %v2580_v48 }
0x1b45   :  { %v1200_v47 = vpop.permute.xlu1 %1199 }
0x1b46   :  { %v1202_v51 = vmul.f32 %v1200_v47, %v1194_v49 }
0x1b48   :  { %1204 = vrot.lane.b32.xlu2 %v1202_v51, %s2243_s3 }
0x1ba2   :  { %v1205_v55 = vpop.permute.xlu2 %1204 }
0x1ba3   :  { %v2633_v56 = vadd.f32 %v1205_v55, %v1197_v54 }
0x1ba5   :  { %2052 = vtanh.f32 %v2633_v56  ;;  %1260 = vrot.lane.b32.xlu2 %v2633_v56, %s2244_s11 }
0x1bab   :  { %v2053_v5 = vpop.eup %2052 }
0x1bac   :  { %1210 = vrot.lane.b32.xlu0 %v2053_v5, %s2242_s2 }
0x1bff   :  { %v1261_v32 = vpop.permute.xlu2 %1260 }
0x1c00   :  { %1914 = vmatmul.msk.f32.vlgmr.msra.gmra.mxu3 %vm103_vm0, %v1261_v32 }
0x1c1e   :  { %v1211_v60 = vpop.permute.xlu0 %1210 }
0x1c1f   :  { %v1213_v61 = vmul.f32 %v1211_v60, %v1194_v49 }
0x1c21   :  { %1215 = vrot.lane.b32.xlu0 %v1213_v61, %s2243_s3 }
0x1c83   :  { %v1281_v48 = vpop.f32.mrf.mxu3 }
0x1c93   :  { %v1216_v62 = vpop.permute.xlu0 %1215 }
0x1c94   :  { %1912 = vmatmul.msk.f32.vlgmr.msra.gmra.mxu1 %vm103_vm0, %v1216_v62  ;;  %1913 = vmatmul.msk.f32.vlgmr.msra.gmra.mxu2 %vm103_vm0, %v1216_v62 }
0x1c95   :  { %1704 = vmatpush.msra.mxu1 %v2533_v2 }
0x1c97   :  { %1705 = vmatpush.msra.mxu1 %v2537_v1 }
0x1c99   :  { %1706 = vmatpush.msra.mxu1 %v2541_v9 }
0x1c9b   :  { %1707 = vmatpush.msra.mxu1 %v2593_v52 }
0x1d11   :  { %v1236_v0 = vpop.f32.mrf.mxu1 }
0x1d12   :  { %v1284_v63 = vadd.f32 %v1281_v48, %v1236_v0 }
0x1d14   :  { %v1286_v15 = vrot.slane %v1284_v63, 1  ;;  %v1287_v16 = vperm.slane %v1284_v63, 0 }
0x1d16   :  { %v1288_v17 = vperm.slane %v1286_v15, 0  ;;  %v1291_v6 = vadd.f32 %v1287_v16, %v2339_v19 }
0x1d18   :  { %v1292_v4 = vadd.f32 %v1288_v17, %v2341_v24  ;;  %2054 = vtanh.f32 %v1291_v6 }
0x1d1a   :  { %2056 = vtanh.f32 %v1292_v4 }
0x1d1e   :  { %v2055_v3 = vpop.eup %2054 }
0x1d1f   :  { %v1295_v2 = vmul.f32 %v2598_v11, %v2055_v3 }
0x1d20   :  { %v2057_v1 = vpop.eup %2056 }
0x1d21   :  { %v1297_v9 = vsel %vm103_vm0, %v1295_v2, 0.0  ;;  %v1296_v52 = vmul.f32 %v2598_v11, %v2057_v1 }
0x1d22   :  { %1298 = vadd.xlane.f32.xlu2 %v1297_v9 }
0x1d23   :  { %v1300_v18 = vsel %vm103_vm0, %v1296_v52, 0.0  ;;  %v2248_v52 = vmov 5  }
0x1d24   :  { %1301 = vadd.xlane.f32.xlu0 %v1300_v18 }
0x1d95   :  { %v1299_v7 = vpop.xlane.xlu2 %1298 }
0x1d96   :  { %v1305_v8 = vperm.slane %v1299_v7, %v2351_v37 }
0x1d97   :  { %v1302_v21 = vpop.xlane.xlu0 %1301 }
0x1d98   :  { %v1306_v13 = vperm.slane %v1302_v21, %v2351_v37 }
0x1d9a   :  { %v1307_v22 = vsel %vm234_vm1, %v1306_v13, %v1305_v8  ;;  %v1256_v13 = vpop.f32.mrf.mxu2 }
0x1d9b   :  { %v1309_v14 = vsel %vm237_vm2, %v1307_v22, -inf }
0x1d9c   :  { %1310 = vmax.xlane.f32.xlu1 %v1309_v14 }
0x1e0f   :  { %v1311_v23 = vpop.xlane.xlu1 %1310 }
0x1e10   :  { %v1313_v25 = vperm.slane %v1311_v23, 0  ;;  %v1314_v26 = vperm.slane %v1311_v23, 1 }
0x1e12   :  { %v1317_v12 = vsub.f32 %v1299_v7, %v1313_v25  ;;  %v1318_v27 = vsub.f32 %v1302_v21, %v1314_v26 }
0x1e14   :  { %v1319_v36 = vmul.f32 1.442695, %v1317_v12  ;;  %v1321_v29 = vmul.f32 1.442695, %v1318_v27 }
0x1e16   :  { %2058 = vpow2.f32 %v1319_v36 }
0x1e17   :  { %2060 = vpow2.f32 %v1321_v29 }
0x1e1c   :  { %v2059_v30 = vpop.eup %2058 }
0x1e1d   :  { %v2061_v28 = vpop.eup %2060  ;;  %1326 = vperm.xlu2 %1956, %v2059_v30  }
0x1e1e   :  { %1329 = vperm.xlu0 %1953, %v2061_v28  }
0x1e77   :  { %v1327_v33 = vpop.permute.xlu2 %1326 }
0x1e78   :  { %v1331_v35 = vperm.slane %v1327_v33, %v2351_v37 }
0x1e90   :  { %v1330_v34 = vpop.permute.xlu0 %1329 }
0x1e91   :  { %v1332_v38 = vperm.slane %v1330_v34, %v2351_v37 }
0x1e93   :  { %v1333_v39 = vsel %vm234_vm1, %v1332_v38, %v1331_v35 }
0x1e94   :  { %v1335_v53 = vsel %vm237_vm2, %v1333_v39, 0.0 }
0x1e95   :  { %1336 = vadd.xlane.f32.xlu1 %v1335_v53 }
0x1f08   :  { %v1337_v40 = vpop.xlane.xlu1 %1336 }
0x1f09   :  { %2062 = vrcp.f32 %v1337_v40 }
0x1f0f   :  { %v2063_v57 = vpop.eup %2062 }
0x1f10   :  { %v1341_v41 = vperm.slane %v2063_v57, 1  ;;  %v1340_v42 = vperm.slane %v2063_v57, 0 }
0x1f12   :  { %v1345_v44 = vmul.f32 %v2061_v28, %v1341_v41  ;;  %v1344_v45 = vmul.f32 %v2059_v30, %v1340_v42 }
0x1f14   :  { %1353 = vperm.xlu1 %1957, %v1345_v44   ;;  %1348 = vperm.xlu2 %1956, %v1344_v45  }
0x1f1c   :  { %1958 = vset.pattern.permute.xlu2 %v2248_v52 }
0x1f6e   :  { %v1349_v46 = vpop.permute.xlu2 %1348 }
0x1f6f   :  { %v1356_v47 = vmul.f32 %v2564_v59, %v1349_v46 }
0x1f71   :  { %v1358_v49 = vsel %vm103_vm0, %v1356_v47, 0.0 }
0x1f72   :  { %v1359_v51 = vrot.slane %v1358_v49, 4 }
0x1f74   :  { %v1360_v54 = vadd.f32 %v1359_v51, %v1358_v49 }
0x1f76   :  { %v1361_v32 = vrot.slane %v1360_v54, 2 }
0x1f78   :  { %v1362_v62 = vadd.f32 %v1361_v32, %v1360_v54 }
0x1f7a   :  { %v1363_v63 = vrot.slane %v1362_v62, 1 }
0x1f7c   :  { %v1364_v17 = vadd.f32 %v1363_v63, %v1362_v62 }
0x1f7e   :  { %v1372_v3 = vmul.f32 %v2616_v20, %v1364_v17 }
0x1f86   :  { %v1354_v55 = vpop.permute.xlu1 %1353 }
0x1f87   :  { %v1357_v5 = vmul.f32 %v2561_v58, %v1354_v55 }
0x1f89   :  { %v1365_v60 = vsel %vm103_vm0, %v1357_v5, 0.0 }
0x1f8a   :  { %v1366_v61 = vrot.slane %v1365_v60, 4 }
0x1f8c   :  { %v1367_v48 = vadd.f32 %v1366_v61, %v1365_v60 }
0x1f8e   :  { %v1368_v0 = vrot.slane %v1367_v48, 2 }
0x1f90   :  { %v1369_v15 = vadd.f32 %v1368_v0, %v1367_v48 }
0x1f92   :  { %v1370_v16 = vrot.slane %v1369_v15, 1 }
0x1f94   :  { %v1371_v6 = vadd.f32 %v1370_v16, %v1369_v15 }
0x1f96   :  { %v1373_v4 = vmul.f32 %v2616_v20, %v1371_v6 }
0x1f98   :  { %v1376_v2 = vrot.slane %v1373_v4, 7 }
0x1f9a   :  { %v1377_v1 = vsel %vm234_vm1, %v1376_v2, %v1372_v3 }
0x1f9b   :  { %v1379_v9 = vsel %vm308_vm3, %v1377_v1, 0.0 }
0x1f9c   :  { %1380 = vadd.xlane.f32.xlu0 %v1379_v9 }
0x200f   :  { %v1381_v18 = vpop.xlane.xlu0 %1380 }
0x2010   :  { %v1382_v7 = vadd.f32 %v1381_v18, %v2405_v50 }
0x2012   :  { %1385 = vperm.xlu2 %1958, %v1382_v7  }
0x201a   :  { %1959 = vset.pattern.permute.xlu2 %v2240_v43 }
0x206c   :  { %v1386_v21 = vpop.permute.xlu2 %1385 }
0x206d   :  { %v1388_v8 = vmul.f32 %v2624_v10, %v1386_v21 }
0x206f   :  { %v1389_v22 = vadd.f32 %v1388_v8, %v1256_v13 }
0x2071   :  { %v1390_v14 = vadd.f32 %v2627_v31, %v1389_v22 }
0x2073   :  { %2064 = vtanh.f32 %v1390_v14  ;;  %v1915_v25 = vmul.f32 -1.442695, %v1390_v14 }
0x2075   :  { %2066 = vpow2.f32 %v1915_v25 }
0x2079   :  { %v2065_v23 = vpop.eup %2064 }
0x207a   :  { %1413 = vrot.lane.b32.xlu2 %v2065_v23, %s2242_s2 }
0x207b   :  { %v2067_v26 = vpop.eup %2066 }
0x207c   :  { %v1394_v12 = vadd.f32 1.0, %v2067_v26 }
0x207e   :  { %2068 = vrcp.f32 %v1394_v12  ;;  %v1406_v33 = vand.u32 2147483648, %v1394_v12  ;;  %vm1400_vm13 = vweird.f32 %v1394_v12  ;;  %v1404_v34 = vand.u32 2147483647, %v1394_v12 }
0x2080   :  { %v1407_v38 = vor.u32 1.1754944e-38, %v1406_v33  ;;  %vm1405_vm15 = vcmp.eq.f32.partialorder %v1404_v34, 8.507059e+37 }
0x2084   :  { %v2069_v27 = vpop.eup %2068 }
0x2085   :  { %v1396_v36 = vmul.f32 %v2069_v27, %v1394_v12  ;;  %vm1401_vm12 = vweird.f32 %v2069_v27 }
0x2086   :  { %vm1402_vm14 = vmor %vm1400_vm13, %vm1401_vm12 }
0x2087   :  { %v1397_v29 = vsub.f32 1.0, %v1396_v36 }
0x2089   :  { %v1398_v30 = vmul.f32 %v2069_v27, %v1397_v29 }
0x208b   :  { %v1399_v28 = vadd.f32 %v2069_v27, %v1398_v30 }
0x208d   :  { %v1403_v35 = vsel %vm1402_vm14, %v2069_v27, %v1399_v28 }
0x208e   :  { %v1408_v53 = vsel %vm1405_vm15, %v1407_v38, %v1403_v35 }
0x208f   :  { %v1411_v57 = vmul.f32 %v1408_v53, %v2633_v56 }
0x20d4   :  { %v1414_v39 = vpop.permute.xlu2 %1413 }
0x20d5   :  { %v1416_v40 = vmul.f32 %v1414_v39, %v1408_v53 }
0x20d7   :  { %1418 = vrot.lane.b32.xlu1 %v1416_v40, %s2243_s3 }
0x2149   :  { %v1419_v41 = vpop.permute.xlu1 %1418 }
0x214a   :  { %v2676_v42 = vadd.f32 %v1419_v41, %v1411_v57 }
0x214c   :  { %2070 = vtanh.f32 %v2676_v42  ;;  %1474 = vrot.lane.b32.xlu1 %v2676_v42, %s2244_s11 }
0x2152   :  { %v2071_v44 = vpop.eup %2070 }
0x2153   :  { %1424 = vrot.lane.b32.xlu2 %v2071_v44, %s2242_s2 }
0x21ad   :  { %v1425_v45 = vpop.permute.xlu2 %1424 }
0x21ae   :  { %v1427_v46 = vmul.f32 %v1425_v45, %v1408_v53 }
0x21b0   :  { %1429 = vrot.lane.b32.xlu2 %v1427_v46, %s2243_s3 }
0x21be   :  { %v1475_v47 = vpop.permute.xlu1 %1474 }
0x21bf   :  { %1918 = vmatmul.msk.f32.vlgmr.msrb.gmra.mxu2 %vm103_vm0, %v1475_v47 }
0x220a   :  { %v1430_v49 = vpop.permute.xlu2 %1429 }
0x220b   :  { %1916 = vmatmul.msk.f32.vlgmr.msra.gmra.mxu0 %vm103_vm0, %v1430_v49  ;;  %1917 = vmatmul.msk.f32.vlgmr.msrb.gmra.mxu1 %vm103_vm0, %v1430_v49 }
0x2242   :  { %v1495_v56 = vpop.f32.mrf.mxu2 }
0x2288   :  { %v1450_v51 = vpop.f32.mrf.mxu0 }
0x2289   :  { %v1498_v54 = vadd.f32 %v1495_v56, %v1450_v51 }
0x228b   :  { %v1500_v55 = vrot.slane %v1498_v54, 1  ;;  %v1501_v5 = vperm.slane %v1498_v54, 0 }
0x228d   :  { %v1502_v32 = vperm.slane %v1500_v55, 0  ;;  %v1505_v60 = vadd.f32 %v1501_v5, %v2339_v19 }
0x228f   :  { %v1506_v61 = vadd.f32 %v1502_v32, %v2341_v24  ;;  %2072 = vtanh.f32 %v1505_v60 }
0x2291   :  { %2074 = vtanh.f32 %v1506_v61 }
0x2295   :  { %v2073_v62 = vpop.eup %2072 }
0x2296   :  { %v1509_v48 = vmul.f32 %v2598_v11, %v2073_v62 }
0x2297   :  { %v2075_v0 = vpop.eup %2074 }
0x2298   :  { %v1511_v63 = vsel %vm103_vm0, %v1509_v48, 0.0  ;;  %v1510_v15 = vmul.f32 %v2598_v11, %v2075_v0 }
0x2299   :  { %1512 = vadd.xlane.f32.xlu1 %v1511_v63 }
0x229a   :  { %v1514_v16 = vsel %vm103_vm0, %v1510_v15, 0.0 }
0x229b   :  { %1515 = vadd.xlane.f32.xlu2 %v1514_v16 }
0x230c   :  { %v1513_v17 = vpop.xlane.xlu1 %1512 }
0x230d   :  { %v1519_v4 = vperm.slane %v1513_v17, %v2351_v37 }
0x230e   :  { %v1516_v6 = vpop.xlane.xlu2 %1515 }
0x230f   :  { %v1520_v3 = vperm.slane %v1516_v6, %v2351_v37 }
0x2311   :  { %v1521_v2 = vsel %vm234_vm1, %v1520_v3, %v1519_v4 }
0x2312   :  { %v1523_v1 = vsel %vm237_vm2, %v1521_v2, -inf }
0x2313   :  { %1524 = vmax.xlane.f32.xlu0 %v1523_v1 }
0x2386   :  { %v1525_v9 = vpop.xlane.xlu0 %1524 }
0x2387   :  { %v1527_v52 = vperm.slane %v1525_v9, 0  ;;  %v1528_v18 = vperm.slane %v1525_v9, 1 }
0x2389   :  { %v1531_v7 = vsub.f32 %v1513_v17, %v1527_v52  ;;  %v1532_v8 = vsub.f32 %v1516_v6, %v1528_v18  ;;  %v1470_v6 = vpop.f32.mrf.mxu1 }
0x238b   :  { %v1533_v21 = vmul.f32 1.442695, %v1531_v7  ;;  %v1535_v13 = vmul.f32 1.442695, %v1532_v8 }
0x238d   :  { %2076 = vpow2.f32 %v1533_v21 }
0x238e   :  { %2078 = vpow2.f32 %v1535_v13 }
0x2393   :  { %v2077_v22 = vpop.eup %2076 }
0x2394   :  { %1540 = vperm.xlu0 %1953, %v2077_v22   ;;  %v2079_v14 = vpop.eup %2078 }
0x239c   :  { %1543 = vperm.xlu0 %1953, %v2079_v14  }
0x2406   :  { %v1541_v23 = vpop.permute.xlu0 %1540 }
0x2407   :  { %v1545_v26 = vperm.slane %v1541_v23, %v2351_v37 }
0x240e   :  { %v1544_v25 = vpop.permute.xlu0 %1543 }
0x240f   :  { %v1546_v12 = vperm.slane %v1544_v25, %v2351_v37 }
0x2411   :  { %v1547_v27 = vsel %vm234_vm1, %v1546_v12, %v1545_v26 }
0x2412   :  { %v1549_v36 = vsel %vm237_vm2, %v1547_v27, 0.0 }
0x2413   :  { %1550 = vadd.xlane.f32.xlu1 %v1549_v36 }
0x2486   :  { %v1551_v29 = vpop.xlane.xlu1 %1550 }
0x2487   :  { %2080 = vrcp.f32 %v1551_v29 }
0x248d   :  { %v2081_v30 = vpop.eup %2080 }
0x248e   :  { %v1555_v28 = vperm.slane %v2081_v30, 1  ;;  %v1554_v33 = vperm.slane %v2081_v30, 0 }
0x2490   :  { %v1559_v34 = vmul.f32 %v2079_v14, %v1555_v28  ;;  %v1558_v35 = vmul.f32 %v2077_v22, %v1554_v33 }
0x2492   :  { %1567 = vperm.xlu2 %1959, %v1559_v34   ;;  %1562 = vperm.xlu0 %1953, %v1558_v35  }
0x24ec   :  { %v1568_v38 = vpop.permute.xlu2 %1567 }
0x24ed   :  { %v1571_v39 = vmul.f32 %v2561_v58, %v1568_v38 }
0x24ef   :  { %v1579_v53 = vsel %vm103_vm0, %v1571_v39, 0.0 }
0x24f0   :  { %v1580_v40 = vrot.slane %v1579_v53, 4 }
0x24f2   :  { %v1581_v57 = vadd.f32 %v1580_v40, %v1579_v53 }
0x24f4   :  { %v1582_v41 = vrot.slane %v1581_v57, 2 }
0x24f6   :  { %v1583_v44 = vadd.f32 %v1582_v41, %v1581_v57 }
0x24f8   :  { %v1584_v49 = vrot.slane %v1583_v44, 1 }
0x24fa   :  { %v1585_v54 = vadd.f32 %v1584_v49, %v1583_v44 }
0x24fc   :  { %v1587_v58 = vmul.f32 %v2616_v20, %v1585_v54 }
0x24fe   :  { %v1590_v62 = vrot.slane %v1587_v58, 7 }
0x2504   :  { %v1563_v45 = vpop.permute.xlu0 %1562 }
0x2505   :  { %v1570_v46 = vmul.f32 %v2564_v59, %v1563_v45  ;;  %v2249_v59 = vmov 6  }
0x2506   :  { %1960 = vset.pattern.permute.xlu0 %v2249_v59 }
0x2507   :  { %v1572_v47 = vsel %vm103_vm0, %v1570_v46, 0.0 }
0x2508   :  { %v1573_v56 = vrot.slane %v1572_v47, 4 }
0x250a   :  { %v1574_v51 = vadd.f32 %v1573_v56, %v1572_v47 }
0x250c   :  { %v1575_v55 = vrot.slane %v1574_v51, 2 }
0x250e   :  { %v1576_v5 = vadd.f32 %v1575_v55, %v1574_v51 }
0x2510   :  { %v1577_v32 = vrot.slane %v1576_v5, 1 }
0x2512   :  { %v1578_v60 = vadd.f32 %v1577_v32, %v1576_v5 }
0x2514   :  { %v1586_v61 = vmul.f32 %v2616_v20, %v1578_v60 }
0x2516   :  { %v1591_v48 = vsel %vm234_vm1, %v1590_v62, %v1586_v61 }
0x2517   :  { %v1593_v0 = vsel %vm308_vm3, %v1591_v48, 0.0 }
0x2518   :  { %1594 = vadd.xlane.f32.xlu1 %v1593_v0 }
0x258b   :  { %v1595_v63 = vpop.xlane.xlu1 %1594 }
0x258c   :  { %v1596_v15 = vadd.f32 %v1595_v63, %v2405_v50 }
0x258e   :  { %1599 = vperm.xlu0 %1960, %v1596_v15  }
0x2596   :  { %1961 = vset.pattern.permute.xlu0 %v2240_v43 }
0x2600   :  { %v1600_v16 = vpop.permute.xlu0 %1599 }
0x2601   :  { %v1602_v17 = vmul.f32 %v2624_v10, %v1600_v16 }
0x2603   :  { %v1603_v4 = vadd.f32 %v1602_v17, %v1470_v6 }
0x2605   :  { %v1604_v3 = vadd.f32 %v2627_v31, %v1603_v4 }
0x2607   :  { %2082 = vtanh.f32 %v1604_v3  ;;  %v1919_v1 = vmul.f32 -1.442695, %v1604_v3 }
0x2609   :  { %2084 = vpow2.f32 %v1919_v1 }
0x260d   :  { %v2083_v2 = vpop.eup %2082 }
0x260e   :  { %1627 = vrot.lane.b32.xlu1 %v2083_v2, %s2242_s2 }
0x260f   :  { %v2085_v9 = vpop.eup %2084 }
0x2610   :  { %v1608_v52 = vadd.f32 1.0, %v2085_v9 }
0x2612   :  { %2086 = vrcp.f32 %v1608_v52  ;;  %v1620_v13 = vand.u32 2147483648, %v1608_v52  ;;  %vm1614_vm5 = vweird.f32 %v1608_v52  ;;  %v1618_v22 = vand.u32 2147483647, %v1608_v52 }
0x2614   :  { %v1621_v23 = vor.u32 1.1754944e-38, %v1620_v13  ;;  %vm1619_vm7 = vcmp.eq.f32.partialorder %v1618_v22, 8.507059e+37  ;;  %v2127_v22 = vld [vmem:[#allocation2] sm:$0xff] }
0x2618   :  { %v2087_v18 = vpop.eup %2086 }
0x2619   :  { %v1610_v7 = vmul.f32 %v2087_v18, %v1608_v52  ;;  %vm1615_vm4 = vweird.f32 %v2087_v18 }
0x261a   :  { %vm1616_vm6 = vmor %vm1614_vm5, %vm1615_vm4 }
0x261b   :  { %v1611_v21 = vsub.f32 1.0, %v1610_v7 }
0x261d   :  { %v1612_v43 = vmul.f32 %v2087_v18, %v1611_v21 }
0x261f   :  { %v1613_v8 = vadd.f32 %v2087_v18, %v1612_v43 }
0x2621   :  { %v1617_v14 = vsel %vm1616_vm6, %v2087_v18, %v1613_v8  ;;  %v2126_v8 = vld [vmem:[#allocation2 + $0x8] sm:$0xff] }
0x2622   :  { %v1622_v26 = vsel %vm1619_vm7, %v1621_v23, %v1617_v14 }
0x2623   :  { %v1625_v27 = vmul.f32 %v1622_v26, %v2676_v42 }
0x2680   :  { %v1628_v25 = vpop.permute.xlu1 %1627 }
0x2681   :  { %v1630_v12 = vmul.f32 %v1628_v25, %v1622_v26 }
0x2683   :  { %1632 = vrot.lane.b32.xlu2 %v1630_v12, %s2243_s3 }
0x26dd   :  { %v1633_v36 = vpop.permute.xlu2 %1632 }
0x26de   :  { %v2715_v29 = vadd.f32 %v1633_v36, %v1625_v27 }
0x26e0   :  { %2088 = vtanh.f32 %v2715_v29 }
0x26e6   :  { %v2089_v30 = vpop.eup %2088 }
0x26e7   :  { %1638 = vrot.lane.b32.xlu0 %v2089_v30, %s2242_s2 }
0x26ef   :  { %1688 = vrot.lane.b32.xlu0 %v2715_v29, %s2244_s11 }
0x2759   :  { %v1639_v28 = vpop.permute.xlu0 %1638 }
0x275a   :  { %v1641_v33 = vmul.f32 %v1639_v28, %v1622_v26 }
0x275c   :  { %1643 = vrot.lane.b32.xlu2 %v1641_v33, %s2243_s3 }
0x2761   :  { %v1689_v34 = vpop.permute.xlu0 %1688 }
0x2762   :  { %1922 = vmatmul.msk.f32.vlgmr.msra.gmra.mxu1 %vm103_vm0, %v1689_v34 }
0x27b6   :  { %v1644_v35 = vpop.permute.xlu2 %1643 }
0x27b7   :  { %1920 = vmatmul.msk.f32.vlgmr.msrb.gmra.mxu3 %vm103_vm0, %v1644_v35  ;;  %1921 = vmatmul.msk.f32.vlgmr.msrb.gmra.mxu0 %vm103_vm0, %v1644_v35 }
0x27df   :  { %v1709_v42 = vpop.f32.mrf.mxu1 }
0x283a   :  { %v1664_v38 = vpop.f32.mrf.mxu3 }
0x283b   :  { %v1712_v39 = vadd.f32 %v1709_v42, %v1664_v38 }
0x283d   :  { %v1714_v53 = vrot.slane %v1712_v39, 1  ;;  %v1715_v40 = vperm.slane %v1712_v39, 0  ;;  %v101_v39 = vld [vmem:[#allocation7 + $0x6] ss:$0 sm:$0xff] }
0x283f   :  { %v1716_v57 = vperm.slane %v1714_v53, 0  ;;  %v1719_v41 = vadd.f32 %v1715_v40, %v2339_v19 }
0x2841   :  { %v1720_v44 = vadd.f32 %v1716_v57, %v2341_v24  ;;  %2090 = vtanh.f32 %v1719_v41 }
0x2843   :  { %2092 = vtanh.f32 %v1720_v44 }
0x2847   :  { %v2091_v45 = vpop.eup %2090 }
0x2848   :  { %v1723_v46 = vmul.f32 %v2598_v11, %v2091_v45 }
0x2849   :  { %v2093_v47 = vpop.eup %2092 }
0x284a   :  { %v1725_v49 = vsel %vm103_vm0, %v1723_v46, 0.0  ;;  %v1724_v56 = vmul.f32 %v2598_v11, %v2093_v47 }
0x284b   :  { %1726 = vadd.xlane.f32.xlu1 %v1725_v49 }
0x284c   :  { %v1728_v51 = vsel %vm103_vm0, %v1724_v56, 0.0 }
0x284d   :  { %1729 = vadd.xlane.f32.xlu2 %v1728_v51  ;;  %v2250_v51 = vmov 7  }
0x28be   :  { %v1727_v54 = vpop.xlane.xlu1 %1726 }
0x28bf   :  { %v1733_v19 = vperm.slane %v1727_v54, %v2351_v37 }
0x28c0   :  { %v1730_v55 = vpop.xlane.xlu2 %1729 }
0x28c1   :  { %v1734_v24 = vperm.slane %v1730_v55, %v2351_v37 }
0x28c3   :  { %v1735_v5 = vsel %vm234_vm1, %v1734_v24, %v1733_v19  ;;  %v1684_v24 = vpop.f32.mrf.mxu0 }
0x28c4   :  { %v1737_v32 = vsel %vm237_vm2, %v1735_v5, -inf }
0x28c5   :  { %1738 = vmax.xlane.f32.xlu0 %v1737_v32 }
0x2938   :  { %v1739_v58 = vpop.xlane.xlu0 %1738 }
0x2939   :  { %v1741_v60 = vperm.slane %v1739_v58, 0  ;;  %v1742_v61 = vperm.slane %v1739_v58, 1 }
0x293b   :  { %v1745_v62 = vsub.f32 %v1727_v54, %v1741_v60  ;;  %v1746_v11 = vsub.f32 %v1730_v55, %v1742_v61 }
0x293d   :  { %v1747_v48 = vmul.f32 1.442695, %v1745_v62  ;;  %v1749_v0 = vmul.f32 1.442695, %v1746_v11 }
0x293f   :  { %2094 = vpow2.f32 %v1747_v48 }
0x2940   :  { %2096 = vpow2.f32 %v1749_v0 }
0x2945   :  { %v2095_v59 = vpop.eup %2094 }
0x2946   :  { %v2097_v63 = vpop.eup %2096  ;;  %1754 = vperm.xlu1 %1957, %v2095_v59  }
0x2947   :  { %1757 = vperm.xlu2 %1959, %v2097_v63  }
0x29a1   :  { %v1758_v15 = vpop.permute.xlu2 %1757 }
0x29a2   :  { %v1760_v17 = vperm.slane %v1758_v15, %v2351_v37 }
0x29b8   :  { %v1755_v16 = vpop.permute.xlu1 %1754 }
0x29b9   :  { %v1759_v6 = vperm.slane %v1755_v16, %v2351_v37 }
0x29bb   :  { %v1761_v4 = vsel %vm234_vm1, %v1760_v17, %v1759_v6 }
0x29bc   :  { %v1763_v3 = vsel %vm237_vm2, %v1761_v4, 0.0  ;;  %v100_v4 = vld [vmem:[#allocation7 + $0x5] ss:$0 sm:$0xff] }
0x29bd   :  { %1764 = vadd.xlane.f32.xlu0 %v1763_v3 }
0x2a30   :  { %v1765_v2 = vpop.xlane.xlu0 %1764 }
0x2a31   :  { %2098 = vrcp.f32 %v1765_v2 }
0x2a37   :  { %v2099_v1 = vpop.eup %2098 }
0x2a38   :  { %v1769_v9 = vperm.slane %v2099_v1, 1  ;;  %v1768_v52 = vperm.slane %v2099_v1, 0 }
0x2a3a   :  { %v1773_v18 = vmul.f32 %v2097_v63, %v1769_v9  ;;  %v1772_v7 = vmul.f32 %v2095_v59, %v1768_v52 }
0x2a3c   :  { %1781 = vperm.xlu0 %1961, %v1773_v18   ;;  %1776 = vperm.xlu1 %1957, %v1772_v7  }
0x2a44   :  { %1962 = vset.pattern.permute.xlu1 %v2250_v51  ;;  %1963 = vset.pattern.permute.xlu0 %v2250_v51 }
0x2aae   :  { %v1782_v21 = vpop.permute.xlu0 %1781  ;;  %v1777_v43 = vpop.permute.xlu1 %1776 }
0x2aaf   :  { %v1785_v13 = vmul.f32 %v2126_v8, %v1782_v21  ;;  %v1784_v37 = vmul.f32 %v2127_v22, %v1777_v43 }
0x2ab1   :  { %v1793_v14 = vsel %vm103_vm0, %v1785_v13, 0.0  ;;  %v1786_v23 = vsel %vm103_vm0, %v1784_v37, 0.0 }
0x2ab2   :  { %v1794_v25 = vrot.slane %v1793_v14, 4  ;;  %v1787_v26 = vrot.slane %v1786_v23, 4 }
0x2ab4   :  { %v1795_v12 = vadd.f32 %v1794_v25, %v1793_v14  ;;  %v1788_v27 = vadd.f32 %v1787_v26, %v1786_v23 }
0x2ab6   :  { %v1796_v36 = vrot.slane %v1795_v12, 2  ;;  %v1789_v30 = vrot.slane %v1788_v27, 2 }
0x2ab8   :  { %v1797_v28 = vadd.f32 %v1796_v36, %v1795_v12  ;;  %v1790_v33 = vadd.f32 %v1789_v30, %v1788_v27 }
0x2aba   :  { %v1798_v34 = vrot.slane %v1797_v28, 1  ;;  %v1791_v35 = vrot.slane %v1790_v33, 1 }
0x2abc   :  { %v1799_v42 = vadd.f32 %v1798_v34, %v1797_v28  ;;  %v1792_v38 = vadd.f32 %v1791_v35, %v1790_v33 }
0x2abe   :  { %v1801_v53 = vmul.f32 %v2616_v20, %v1799_v42  ;;  %v1800_v40 = vmul.f32 %v2616_v20, %v1792_v38  ;;  %v1869_v41 = vmul.f32 %v1799_v42, %v101_v39  ;;  %v1868_v47 = vmul.f32 %v1792_v38, %v101_v39 }
0x2ac0   :  { %v1804_v57 = vrot.slane %v1801_v53, 7  ;;  %v1872_v46 = vrot.slane %v1869_v41, 7 }
0x2ac2   :  { %v1805_v44 = vsel %vm234_vm1, %v1804_v57, %v1800_v40  ;;  %v1873_v49 = vsel %vm234_vm1, %v1872_v46, %v1868_v47 }
0x2ac3   :  { %v1807_v45 = vsel %vm308_vm3, %v1805_v44, 0.0  ;;  %v1875_v56 = vsel %vm308_vm3, %v1873_v49, 0.0 }
0x2ac4   :  { %1808 = vadd.xlane.f32.xlu2 %v1807_v45 }
0x2acc   :  { %1876 = vadd.xlane.f32.xlu2 %v1875_v56 }
0x2b37   :  { %v1809_v54 = vpop.xlane.xlu2 %1808 }
0x2b38   :  { %v1810_v20 = vadd.f32 %v1809_v54, %v2405_v50 }
0x2b3a   :  { %1813 = vperm.xlu1 %1962, %v1810_v20  }
0x2b3f   :  { %v1877_v13 = vpop.xlane.xlu2 %1876 }
0x2bac   :  { %v1814_v55 = vpop.permute.xlu1 %1813 }
0x2bad   :  { %v1816_v19 = vmul.f32 %v2624_v10, %v1814_v55 }
0x2baf   :  { %v1817_v5 = vadd.f32 %v1816_v19, %v1684_v24 }
0x2bb1   :  { %v1818_v32 = vadd.f32 %v2627_v31, %v1817_v5 }
0x2bb3   :  { %2100 = vtanh.f32 %v1818_v32  ;;  %v1923_v60 = vmul.f32 -1.442695, %v1818_v32 }
0x2bb5   :  { %2102 = vpow2.f32 %v1923_v60 }
0x2bb9   :  { %v2101_v58 = vpop.eup %2100 }
0x2bba   :  { %1841 = vrot.lane.b32.xlu1 %v2101_v58, %s2242_s2 }
0x2bbb   :  { %v2103_v61 = vpop.eup %2102 }
0x2bbc   :  { %v1822_v62 = vadd.f32 1.0, %v2103_v61 }
0x2bbe   :  { %2104 = vrcp.f32 %v1822_v62  ;;  %v1834_v10 = vand.u32 2147483648, %v1822_v62  ;;  %vm1828_vm1 = vweird.f32 %v1822_v62  ;;  %v1832_v63 = vand.u32 2147483647, %v1822_v62 }
0x2bc0   :  { %v1835_v15 = vor.u32 1.1754944e-38, %v1834_v10  ;;  %vm1833_vm8 = vcmp.eq.f32.partialorder %v1832_v63, 8.507059e+37 }
0x2bc4   :  { %v2105_v11 = vpop.eup %2104 }
0x2bc5   :  { %v1824_v48 = vmul.f32 %v2105_v11, %v1822_v62  ;;  %vm1829_vm0 = vweird.f32 %v2105_v11 }
0x2bc6   :  { %vm1830_vm2 = vmor %vm1828_vm1, %vm1829_vm0 }
0x2bc7   :  { %v1825_v50 = vsub.f32 1.0, %v1824_v48 }
0x2bc9   :  { %v1826_v0 = vmul.f32 %v2105_v11, %v1825_v50 }
0x2bcb   :  { %v1827_v59 = vadd.f32 %v2105_v11, %v1826_v0 }
0x2bcd   :  { %v1831_v31 = vsel %vm1830_vm2, %v2105_v11, %v1827_v59 }
0x2bce   :  { %v1836_v17 = vsel %vm1833_vm8, %v1835_v15, %v1831_v31 }
0x2bcf   :  { %v1839_v3 = vmul.f32 %v1836_v17, %v2715_v29  ;;  %v2128_v29 = vld [vmem:[#allocation7 + $0x7] ss:$0 sm:$0xff] }
0x2c2c   :  { %v1842_v16 = vpop.permute.xlu1 %1841 }
0x2c2d   :  { %v1844_v6 = vmul.f32 %v1842_v16, %v1836_v17 }
0x2c2f   :  { %1846 = vrot.lane.b32.xlu1 %v1844_v6, %s2243_s3 }
0x2c37   :  { %1857 = vrot.lane.b32.xlu1 %v100_v4, %s2244_s11 }
0x2ca1   :  { %v1847_v2 = vpop.permute.xlu1 %1846 }
0x2ca2   :  { %v1849_v1 = vadd.f32 %v1847_v2, %v1839_v3 }
0x2ca4   :  { %2106 = vtanh.f32 %v1849_v1 }
0x2ca9   :  { %v1858_v18 = vpop.permute.xlu1 %1857 }
0x2caa   :  { %v2107_v9 = vpop.eup %2106 }
0x2cab   :  { %1852 = vrot.lane.b32.xlu0 %v2107_v9, %s2242_s2 }
0x2d1d   :  { %v1853_v52 = vpop.permute.xlu0 %1852 }
0x2d1e   :  { %v1855_v7 = vmul.f32 %v1853_v52, %v1836_v17 }
0x2d20   :  { %v1860_v21 = vmul.f32 %v1858_v18, %v1855_v7 }
0x2d22   :  { %1862 = vrot.lane.b32.xlu0 %v1860_v21, %s2243_s3 }
0x2d94   :  { %v1863_v43 = vpop.permute.xlu0 %1862 }
0x2d95   :  { %v1865_v8 = vsel %vm308_vm3, %v1863_v43, 0.0 }
0x2d96   :  { %1866 = vadd.xlane.f32.xlu1 %v1865_v8 }
0x2e09   :  { %v1867_v22 = vpop.xlane.xlu1 %1866 }
0x2e0a   :  { %v1878_v37 = vadd.f32 %v1877_v13, %v1867_v22 }
0x2e0c   :  { %v1879_v14 = vadd.f32 %v2128_v29, %v1878_v37 }
0x2e0e   :  { %1881 = vrot.lane.b32.xlu0 %v1879_v14, %s2251_s12 }
0x2e80   :  { %v1882_v23 = vpop.permute.xlu0 %1881 }
0x2e81   :  { %1885 = vst.msk [vmem:[%s2764_s4] sm:$0x3] %vm1884_vm9, %v1882_v23 }
0x2e82   :  { %1890 = vsyncpa [#allocation3], 1 }
0x2e83   :  { %1891 = vsyncpa [#allocation5], 1 }
0x2e84   :  { %1892 = vsyncpa [#allocation8], 1 }

</bundles_post_ra>
